<compile_context>
chip_gen: v7x
topology: tpu7x:2x2x1
jax: 0.10.0
libtpu: 0.0.40
codegen_flags: <defaults>
</compile_context>

<pallas_src>
import functools

import jax
import jax.numpy as jnp
from jax.experimental import pallas as pl
from jax.experimental.pallas import tpu as pltpu

# ---- model hyper-parameters (small, consistent with the module) -------------
D_MODEL = 32
N_HEAD = 4
HEAD_DIM = D_MODEL // N_HEAD
DIM_FF = 64
NUM_LAYERS = 2
SEQ = 8
BATCH = 2
LN_EPS = 1e-5


def _layer_norm(x, w, b):
    mu = jnp.mean(x, axis=-1, keepdims=True)
    xc = x - mu
    var = jnp.mean(xc * xc, axis=-1, keepdims=True)
    return xc * jax.lax.rsqrt(var + LN_EPS) * w + b


# ------------------------- fused Pallas kernel --------------------------------
def encoder_kernel(x_ref, pos_ref, wqkvo_ref, wffn_ref, bqkv_ref, vec_ref,
                   b1_ref, out_ref, *, num_layers, n_head):
    # One grid step == one batch element: x_ref / pos_ref / out_ref are (S, D).
    S, D = x_ref.shape
    bf16 = jnp.bfloat16
    f32 = jnp.float32

    x = x_ref[...]                         # (S, D) f32
    pos = pos_ref[...]                     # (S, D) f32

    for l in range(num_layers):            # static unroll over layers
        # ---------------- self-attention (head-batched, no slices) ----------
        xp = x + pos                       # q = k = src + pos
        xp_b = jnp.broadcast_to(xp.astype(bf16), (n_head, S, D))   # (H, S, D)
        x_b = jnp.broadcast_to(x.astype(bf16), (n_head, S, D))     # (H, S, D)

        # Projections: batched over heads; head split pre-baked in the weights.
        # wqkvo_ref[l, i] : (H, D, HEAD_DIM) bf16, i = 0:Wq*scale 1:Wk 2:Wv 3:Wo^T
        q3 = jax.lax.dot_general(
            xp_b, wqkvo_ref[l, 0, :, :, :],
            (((2,), (1,)), ((0,), (0,))),
            preferred_element_type=f32) + bqkv_ref[l, 0, :, :, :]   # (H, S, hd)
        k3 = jax.lax.dot_general(
            xp_b, wqkvo_ref[l, 1, :, :, :],
            (((2,), (1,)), ((0,), (0,))),
            preferred_element_type=f32) + bqkv_ref[l, 1, :, :, :]   # (H, S, hd)
        v3 = jax.lax.dot_general(
            x_b, wqkvo_ref[l, 2, :, :, :],
            (((2,), (1,)), ((0,), (0,))),
            preferred_element_type=f32) + bqkv_ref[l, 2, :, :, :]   # (H, S, hd)

        # Scores (scale already folded into Wq/bq), softmax in f32.
        s = jax.lax.dot_general(
            q3.astype(bf16), k3.astype(bf16),
            (((2,), (2,)), ((0,), (0,))),
            preferred_element_type=f32)                             # (H, S, S)
        s = s - jnp.max(s, axis=-1, keepdims=True)
        p = jnp.exp(s)
        p = p * pl.reciprocal(jnp.sum(p, axis=-1, keepdims=True), approx=False)

        pv = jax.lax.dot_general(
            p.astype(bf16), v3.astype(bf16),
            (((2,), (1,)), ((0,), (0,))),
            preferred_element_type=f32)                             # (H, S, hd)

        # Output projection: Wo split along its K dim per head (stored as Wo^T
        # per head), applied batched and summed -> same math as concat @ Wo.
        oh = jax.lax.dot_general(
            pv.astype(bf16), wqkvo_ref[l, 3, :, :, :],
            (((2,), (2,)), ((0,), (0,))),
            preferred_element_type=f32)                             # (H, S, D)
        attn = jnp.sum(oh, axis=0) + vec_ref[6 * l + 0, :, :]       # + bo

        # ---------------- residual + norm1 ----------------------------------
        src = _layer_norm(x + attn, vec_ref[6 * l + 2, :, :], vec_ref[6 * l + 3, :, :])

        # ---------------- feed-forward ---------------------------------------
        h1 = jax.lax.dot_general(
            src.astype(bf16), wffn_ref[l, 0, :, :],
            (((1,), (0,)), ((), ())),
            preferred_element_type=f32) + b1_ref[l, :, :]           # (S, F)
        h1 = jnp.maximum(h1, 0.0)
        ffn = jax.lax.dot_general(
            h1.astype(bf16), wffn_ref[l, 1, :, :],                  # W2 stored transposed
            (((1,), (1,)), ((), ())),
            preferred_element_type=f32) + vec_ref[6 * l + 1, :, :]  # + b2, (S, D)

        # ---------------- residual + norm2 -----------------------------------
        x = _layer_norm(src + ffn, vec_ref[6 * l + 4, :, :], vec_ref[6 * l + 5, :, :])

    # Final LayerNorm.
    out_ref[...] = _layer_norm(
        x, vec_ref[6 * num_layers + 0, :, :], vec_ref[6 * num_layers + 1, :, :]
    ).astype(out_ref.dtype)


# ------------------------- weight packing -------------------------------------
def pack_params(params):
    """Pack per-layer weights into a few contiguous slabs.

    - bf16 matrix slabs (MXU operands), head split done here on the host.
    - f32 vector slabs (biases / LayerNorm params; elementwise math stays f32).
    - 1/sqrt(head_dim) folded into Wq and bq.
    """
    layers = params["layers"]
    scale = 1.0 / (HEAD_DIM ** 0.5)

    def col_heads(w):    # (D_in, D) with head-blocked columns -> (H, D_in, hd)
        return jnp.transpose(w.reshape(w.shape[0], N_HEAD, HEAD_DIM), (1, 0, 2))

    def row_heads_t(w):  # Wo (D, D) with head-blocked rows -> Wo^T per head: (H, D, hd)
        return jnp.transpose(w.reshape(N_HEAD, HEAD_DIM, w.shape[1]), (0, 2, 1))

    def head_bias(b):    # (D,) -> (H, 1, hd)
        return b.reshape(N_HEAD, 1, HEAD_DIM)

    w_qkvo = jnp.stack([
        jnp.stack([col_heads(p["wq"] * scale), col_heads(p["wk"]),
                   col_heads(p["wv"]), row_heads_t(p["wo"])], axis=0)
        for p in layers], axis=0).astype(jnp.bfloat16)          # (L, 4, H, D, hd)

    w_ffn = jnp.stack([
        jnp.stack([p["w1"], p["w2"].T], axis=0) for p in layers],
        axis=0).astype(jnp.bfloat16)                            # (L, 2, D, F)

    b_qkv = jnp.stack([
        jnp.stack([head_bias(p["bq"] * scale), head_bias(p["bk"]),
                   head_bias(p["bv"])], axis=0)
        for p in layers], axis=0).astype(jnp.float32)           # (L, 3, H, 1, hd)

    vec_rows = []
    for p in layers:
        vec_rows += [p["bo"], p["b2"], p["ln1w"], p["ln1b"], p["ln2w"], p["ln2b"]]
    vec_rows += [params["norm_w"], params["norm_b"]]
    vec_d = jnp.stack(vec_rows, axis=0)[:, None, :].astype(jnp.float32)  # (6L+2, 1, D)

    b1 = jnp.stack([p["b1"] for p in layers], axis=0)[:, None, :].astype(jnp.float32)  # (L, 1, F)

    return {"w_qkvo": w_qkvo, "w_ffn": w_ffn, "b_qkv": b_qkv,
            "vec_d": vec_d, "b1": b1}


# ------------------------- wrapper ---------------------------------------------
@jax.jit
def transformer_encoder(src_sbd, pos_sbd, packed):
    S, B, D = src_sbd.shape
    # Batch-major layout: one small wrapper transpose, then a per-batch grid
    # step needs no cross-batch mask and no wasted cross-batch score work.
    x = jnp.transpose(src_sbd, (1, 0, 2))     # (B, S, D)
    pos = jnp.transpose(pos_sbd, (1, 0, 2))   # (B, S, D)

    kernel = functools.partial(encoder_kernel, num_layers=NUM_LAYERS, n_head=N_HEAD)

    def full_spec(arr):
        nd = arr.ndim
        return pl.BlockSpec(arr.shape, lambda b, _nd=nd: (0,) * _nd)

    out = pl.pallas_call(
        kernel,
        out_shape=jax.ShapeDtypeStruct((B, S, D), jnp.float32),
        grid=(B,),
        in_specs=[
            pl.BlockSpec((None, S, D), lambda b: (b, 0, 0)),     # x   (per-batch)
            pl.BlockSpec((None, S, D), lambda b: (b, 0, 0)),     # pos (per-batch)
            full_spec(packed["w_qkvo"]),                         # weights: constant
            full_spec(packed["w_ffn"]),                          # index -> resident
            full_spec(packed["b_qkv"]),
            full_spec(packed["vec_d"]),
            full_spec(packed["b1"]),
        ],
        out_specs=pl.BlockSpec((None, S, D), lambda b: (b, 0, 0)),
        compiler_params=pltpu.CompilerParams(
            dimension_semantics=("parallel",)),                  # v7x: both TCs
    )(x, pos, packed["w_qkvo"], packed["w_ffn"], packed["b_qkv"],
      packed["vec_d"], packed["b1"])

    return jnp.transpose(out, (1, 0, 2))      # back to (S, B, D)


# ------------------------- deterministic param init ----------------------------
def init_params(key):
    def w(k, shape, s=0.05):
        return s * jax.random.normal(k, shape, jnp.float32)

    layers = []
    for l in range(NUM_LAYERS):
        ks = jax.random.split(jax.random.fold_in(key, l), 16)
        layers.append({
            "wq": w(ks[0], (D_MODEL, D_MODEL)), "bq": w(ks[6], (D_MODEL,), 0.02),
            "wk": w(ks[1], (D_MODEL, D_MODEL)), "bk": w(ks[7], (D_MODEL,), 0.02),
            "wv": w(ks[2], (D_MODEL, D_MODEL)), "bv": w(ks[8], (D_MODEL,), 0.02),
            "wo": w(ks[3], (D_MODEL, D_MODEL)), "bo": w(ks[9], (D_MODEL,), 0.02),
            "w1": w(ks[4], (D_MODEL, DIM_FF)),  "b1": w(ks[10], (DIM_FF,), 0.02),
            "w2": w(ks[5], (DIM_FF, D_MODEL)),  "b2": w(ks[11], (D_MODEL,), 0.02),
            "ln1w": 1.0 + w(ks[12], (D_MODEL,), 0.05), "ln1b": w(ks[13], (D_MODEL,), 0.05),
            "ln2w": 1.0 + w(ks[14], (D_MODEL,), 0.05), "ln2b": w(ks[15], (D_MODEL,), 0.05),
        })
    kf = jax.random.split(jax.random.fold_in(key, 100), 2)
    return {
        "layers": layers,
        "norm_w": 1.0 + w(kf[0], (D_MODEL,), 0.05),
        "norm_b": w(kf[1], (D_MODEL,), 0.05),
    }


# ------------------------- pure-JAX reference (f32) -----------------------------
def reference(src_sbd, pos_sbd, params):
    def ln(x, w, b):
        mu = jnp.mean(x, axis=-1, keepdims=True)
        var = jnp.mean((x - mu) ** 2, axis=-1, keepdims=True)
        return (x - mu) * jax.lax.rsqrt(var + LN_EPS) * w + b

    x = jnp.transpose(src_sbd, (1, 0, 2))      # (B, S, D)
    pos = jnp.transpose(pos_sbd, (1, 0, 2))
    for p in params["layers"]:
        qk = x + pos
        q = qk @ p["wq"] + p["bq"]
        k = qk @ p["wk"] + p["bk"]
        v = x @ p["wv"] + p["bv"]
        B, S, D = q.shape
        qh = q.reshape(B, S, N_HEAD, HEAD_DIM).transpose(0, 2, 1, 3)
        kh = k.reshape(B, S, N_HEAD, HEAD_DIM).transpose(0, 2, 1, 3)
        vh = v.reshape(B, S, N_HEAD, HEAD_DIM).transpose(0, 2, 1, 3)
        s = jnp.einsum("bhqd,bhkd->bhqk", qh, kh) / (HEAD_DIM ** 0.5)
        pw = jax.nn.softmax(s, axis=-1)
        attn = jnp.einsum("bhqk,bhkd->bhqd", pw, vh).transpose(0, 2, 1, 3).reshape(B, S, D)
        attn = attn @ p["wo"] + p["bo"]
        x = ln(x + attn, p["ln1w"], p["ln1b"])
        ffn = jnp.maximum(x @ p["w1"] + p["b1"], 0.0) @ p["w2"] + p["b2"]
        x = ln(x + ffn, p["ln2w"], p["ln2b"])
    x = ln(x, params["norm_w"], params["norm_b"])
    return jnp.transpose(x, (1, 0, 2))


if __name__ == "__main__":
    key = jax.random.PRNGKey(0)
    k_src, k_pos, k_par = jax.random.split(key, 3)
    src = jax.random.normal(k_src, (SEQ, BATCH, D_MODEL), jnp.float32)
    pos = jax.random.normal(k_pos, (SEQ, BATCH, D_MODEL), jnp.float32)
    params = init_params(k_par)
    packed = pack_params(params)

    out = jax.block_until_ready(transformer_encoder(src, pos, packed))
    ref = reference(src, pos, params)

    assert out.shape == src.shape
    # Tolerance accounts for bf16 matmul operands (f32 accumulation, f32
    # elementwise); exact softmax reciprocal is used (approx=False).
    if not jnp.allclose(out, ref, atol=2e-2, rtol=2e-2):
        err = float(jnp.max(jnp.abs(out - ref)))
        raise AssertionError(f"Pallas output does not match JAX reference (max abs err {err})")
    print("KERNEL_OK")
</pallas_src>

<mosaic_0001>
module attributes {stable_mosaic.version = 11 : i64} {
  func.func @encoder_kernel(%arg0: i32, %arg1: memref<1x8x32xf32, #tpu.memory_space<vmem>>, %arg2: memref<1x8x32xf32, #tpu.memory_space<vmem>>, %arg3: memref<2x4x4x32x8xbf16, #tpu.memory_space<vmem>>, %arg4: memref<2x2x32x64xbf16, #tpu.memory_space<vmem>>, %arg5: memref<2x3x4x1x8xf32, #tpu.memory_space<vmem>>, %arg6: memref<14x1x32xf32, #tpu.memory_space<vmem>>, %arg7: memref<2x1x64xf32, #tpu.memory_space<vmem>>, %arg8: memref<1x8x32xf32, #tpu.memory_space<vmem>>) attributes {dimension_semantics = [#tpu.dimension_semantics<parallel>], iteration_bounds = array<i64: 2>, scalar_prefetch = 0 : i64, scratch_operands = 0 : i64, tpu.core_type = #tpu.core_type<tc>, window_params = [{transform_indices = @transform_0, window_bounds = array<i64: 1, 8, 32>}, {transform_indices = @transform_1, window_bounds = array<i64: 1, 8, 32>}, {pipeline_mode = #tpu.pipeline_mode<synchronous>, transform_indices = @transform_2, window_bounds = array<i64: 2, 4, 4, 32, 8>}, {pipeline_mode = #tpu.pipeline_mode<synchronous>, transform_indices = @transform_3, window_bounds = array<i64: 2, 2, 32, 64>}, {pipeline_mode = #tpu.pipeline_mode<synchronous>, transform_indices = @transform_4, window_bounds = array<i64: 2, 3, 4, 1, 8>}, {pipeline_mode = #tpu.pipeline_mode<synchronous>, transform_indices = @transform_5, window_bounds = array<i64: 14, 1, 32>}, {pipeline_mode = #tpu.pipeline_mode<synchronous>, transform_indices = @transform_6, window_bounds = array<i64: 2, 1, 64>}, {transform_indices = @transform_7, window_bounds = array<i64: 1, 8, 32>}]} {
    %c0 = arith.constant 0 : index
    %c0_0 = arith.constant 0 : index
    %c0_1 = arith.constant 0 : index
    %0 = vector.load %arg1[%c0, %c0_0, %c0_1] : memref<1x8x32xf32, #tpu.memory_space<vmem>>, vector<1x8x32xf32>
    %1 = vector.shape_cast %0 : vector<1x8x32xf32> to vector<8x32xf32>
    %c0_2 = arith.constant 0 : index
    %c0_3 = arith.constant 0 : index
    %c0_4 = arith.constant 0 : index
    %2 = vector.load %arg2[%c0_2, %c0_3, %c0_4] : memref<1x8x32xf32, #tpu.memory_space<vmem>>, vector<1x8x32xf32>
    %3 = vector.shape_cast %2 : vector<1x8x32xf32> to vector<8x32xf32>
    %4 = arith.addf %1, %3 : vector<8x32xf32>
    %5 = arith.truncf %4 : vector<8x32xf32> to vector<8x32xbf16>
    %6 = vector.shape_cast %5 : vector<8x32xbf16> to vector<1x8x32xbf16>
    %7 = vector.broadcast %6 : vector<1x8x32xbf16> to vector<4x8x32xbf16>
    %8 = arith.truncf %1 : vector<8x32xf32> to vector<8x32xbf16>
    %9 = vector.shape_cast %8 : vector<8x32xbf16> to vector<1x8x32xbf16>
    %10 = vector.broadcast %9 : vector<1x8x32xbf16> to vector<4x8x32xbf16>
    %c0_5 = arith.constant 0 : index
    %c0_6 = arith.constant 0 : index
    %c0_7 = arith.constant 0 : index
    %c0_8 = arith.constant 0 : index
    %c0_9 = arith.constant 0 : index
    %11 = vector.load %arg3[%c0_5, %c0_6, %c0_7, %c0_8, %c0_9] : memref<2x4x4x32x8xbf16, #tpu.memory_space<vmem>>, vector<1x1x4x32x8xbf16>
    %12 = vector.shape_cast %11 : vector<1x1x4x32x8xbf16> to vector<4x32x8xbf16>
    %cst = arith.constant dense<0.000000e+00> : vector<4x8x8xf32>
    %13 = tpu.matmul %7, %12, %cst {dimension_numbers = #tpu.dot_dimension_numbers<[2], [1], [1], [2], [0, 0, 0, 1, 1, 2], [0], [0]>} : vector<4x8x32xbf16>, vector<4x32x8xbf16>, vector<4x8x8xf32> -> vector<4x8x8xf32>
    %c0_10 = arith.constant 0 : index
    %c0_11 = arith.constant 0 : index
    %c0_12 = arith.constant 0 : index
    %c0_13 = arith.constant 0 : index
    %c0_14 = arith.constant 0 : index
    %14 = vector.load %arg5[%c0_10, %c0_11, %c0_12, %c0_13, %c0_14] : memref<2x3x4x1x8xf32, #tpu.memory_space<vmem>>, vector<1x1x4x1x8xf32>
    %15 = vector.shape_cast %14 : vector<1x1x4x1x8xf32> to vector<4x1x8xf32>
    %16 = vector.broadcast %15 : vector<4x1x8xf32> to vector<4x8x8xf32>
    %17 = arith.addf %13, %16 : vector<4x8x8xf32>
    %c0_15 = arith.constant 0 : index
    %c1 = arith.constant 1 : index
    %c0_16 = arith.constant 0 : index
    %c0_17 = arith.constant 0 : index
    %c0_18 = arith.constant 0 : index
    %18 = vector.load %arg3[%c0_15, %c1, %c0_16, %c0_17, %c0_18] : memref<2x4x4x32x8xbf16, #tpu.memory_space<vmem>>, vector<1x1x4x32x8xbf16>
    %19 = vector.shape_cast %18 : vector<1x1x4x32x8xbf16> to vector<4x32x8xbf16>
    %cst_19 = arith.constant dense<0.000000e+00> : vector<4x8x8xf32>
    %20 = tpu.matmul %7, %19, %cst_19 {dimension_numbers = #tpu.dot_dimension_numbers<[2], [1], [1], [2], [0, 0, 0, 1, 1, 2], [0], [0]>} : vector<4x8x32xbf16>, vector<4x32x8xbf16>, vector<4x8x8xf32> -> vector<4x8x8xf32>
    %c0_20 = arith.constant 0 : index
    %c1_21 = arith.constant 1 : index
    %c0_22 = arith.constant 0 : index
    %c0_23 = arith.constant 0 : index
    %c0_24 = arith.constant 0 : index
    %21 = vector.load %arg5[%c0_20, %c1_21, %c0_22, %c0_23, %c0_24] : memref<2x3x4x1x8xf32, #tpu.memory_space<vmem>>, vector<1x1x4x1x8xf32>
    %22 = vector.shape_cast %21 : vector<1x1x4x1x8xf32> to vector<4x1x8xf32>
    %23 = vector.broadcast %22 : vector<4x1x8xf32> to vector<4x8x8xf32>
    %24 = arith.addf %20, %23 : vector<4x8x8xf32>
    %c0_25 = arith.constant 0 : index
    %c2 = arith.constant 2 : index
    %c0_26 = arith.constant 0 : index
    %c0_27 = arith.constant 0 : index
    %c0_28 = arith.constant 0 : index
    %25 = vector.load %arg3[%c0_25, %c2, %c0_26, %c0_27, %c0_28] : memref<2x4x4x32x8xbf16, #tpu.memory_space<vmem>>, vector<1x1x4x32x8xbf16>
    %26 = vector.shape_cast %25 : vector<1x1x4x32x8xbf16> to vector<4x32x8xbf16>
    %cst_29 = arith.constant dense<0.000000e+00> : vector<4x8x8xf32>
    %27 = tpu.matmul %10, %26, %cst_29 {dimension_numbers = #tpu.dot_dimension_numbers<[2], [1], [1], [2], [0, 0, 0, 1, 1, 2], [0], [0]>} : vector<4x8x32xbf16>, vector<4x32x8xbf16>, vector<4x8x8xf32> -> vector<4x8x8xf32>
    %c0_30 = arith.constant 0 : index
    %c2_31 = arith.constant 2 : index
    %c0_32 = arith.constant 0 : index
    %c0_33 = arith.constant 0 : index
    %c0_34 = arith.constant 0 : index
    %28 = vector.load %arg5[%c0_30, %c2_31, %c0_32, %c0_33, %c0_34] : memref<2x3x4x1x8xf32, #tpu.memory_space<vmem>>, vector<1x1x4x1x8xf32>
    %29 = vector.shape_cast %28 : vector<1x1x4x1x8xf32> to vector<4x1x8xf32>
    %30 = vector.broadcast %29 : vector<4x1x8xf32> to vector<4x8x8xf32>
    %31 = arith.addf %27, %30 : vector<4x8x8xf32>
    %32 = arith.truncf %17 : vector<4x8x8xf32> to vector<4x8x8xbf16>
    %33 = arith.truncf %24 : vector<4x8x8xf32> to vector<4x8x8xbf16>
    %cst_35 = arith.constant dense<0.000000e+00> : vector<4x8x8xf32>
    %34 = tpu.matmul %32, %33, %cst_35 {dimension_numbers = #tpu.dot_dimension_numbers<[2], [2], [1], [1], [0, 0, 0, 1, 1, 1], [0], [0]>} : vector<4x8x8xbf16>, vector<4x8x8xbf16>, vector<4x8x8xf32> -> vector<4x8x8xf32>
    %cst_36 = arith.constant dense<0xFF800000> : vector<4x8xf32>
    %35 = vector.multi_reduction <maximumf>, %34, %cst_36 [2] : vector<4x8x8xf32> to vector<4x8xf32>
    %36 = vector.shape_cast %35 : vector<4x8xf32> to vector<4x8x1xf32>
    %37 = vector.broadcast %36 : vector<4x8x1xf32> to vector<4x8x8xf32>
    %38 = arith.subf %34, %37 : vector<4x8x8xf32>
    %39 = math.exp %38 : vector<4x8x8xf32>
    %cst_37 = arith.constant dense<0.000000e+00> : vector<4x8xf32>
    %40 = vector.multi_reduction <add>, %39, %cst_37 [2] : vector<4x8x8xf32> to vector<4x8xf32>
    %41 = vector.shape_cast %40 : vector<4x8xf32> to vector<4x8x1xf32>
    %42 = tpu.reciprocal %41 : vector<4x8x1xf32> -> vector<4x8x1xf32>
    %43 = vector.broadcast %42 : vector<4x8x1xf32> to vector<4x8x8xf32>
    %44 = arith.mulf %39, %43 : vector<4x8x8xf32>
    %45 = arith.truncf %44 : vector<4x8x8xf32> to vector<4x8x8xbf16>
    %46 = arith.truncf %31 : vector<4x8x8xf32> to vector<4x8x8xbf16>
    %cst_38 = arith.constant dense<0.000000e+00> : vector<4x8x8xf32>
    %47 = tpu.matmul %45, %46, %cst_38 {dimension_numbers = #tpu.dot_dimension_numbers<[2], [1], [1], [2], [0, 0, 0, 1, 1, 2], [0], [0]>} : vector<4x8x8xbf16>, vector<4x8x8xbf16>, vector<4x8x8xf32> -> vector<4x8x8xf32>
    %48 = arith.truncf %47 : vector<4x8x8xf32> to vector<4x8x8xbf16>
    %c0_39 = arith.constant 0 : index
    %c3 = arith.constant 3 : index
    %c0_40 = arith.constant 0 : index
    %c0_41 = arith.constant 0 : index
    %c0_42 = arith.constant 0 : index
    %49 = vector.load %arg3[%c0_39, %c3, %c0_40, %c0_41, %c0_42] : memref<2x4x4x32x8xbf16, #tpu.memory_space<vmem>>, vector<1x1x4x32x8xbf16>
    %50 = vector.shape_cast %49 : vector<1x1x4x32x8xbf16> to vector<4x32x8xbf16>
    %cst_43 = arith.constant dense<0.000000e+00> : vector<4x8x32xf32>
    %51 = tpu.matmul %48, %50, %cst_43 {dimension_numbers = #tpu.dot_dimension_numbers<[2], [2], [1], [1], [0, 0, 0, 1, 1, 1], [0], [0]>} : vector<4x8x8xbf16>, vector<4x32x8xbf16>, vector<4x8x32xf32> -> vector<4x8x32xf32>
    %cst_44 = arith.constant dense<0.000000e+00> : vector<8x32xf32>
    %52 = vector.multi_reduction <add>, %51, %cst_44 [0] : vector<4x8x32xf32> to vector<8x32xf32>
    %c0_45 = arith.constant 0 : index
    %c0_46 = arith.constant 0 : index
    %c0_47 = arith.constant 0 : index
    %53 = vector.load %arg6[%c0_45, %c0_46, %c0_47] : memref<14x1x32xf32, #tpu.memory_space<vmem>>, vector<1x1x32xf32>
    %54 = vector.shape_cast %53 : vector<1x1x32xf32> to vector<1x32xf32>
    %55 = vector.broadcast %54 : vector<1x32xf32> to vector<8x32xf32>
    %56 = arith.addf %52, %55 : vector<8x32xf32>
    %57 = arith.addf %1, %56 : vector<8x32xf32>
    %c2_48 = arith.constant 2 : index
    %c0_49 = arith.constant 0 : index
    %c0_50 = arith.constant 0 : index
    %58 = vector.load %arg6[%c2_48, %c0_49, %c0_50] : memref<14x1x32xf32, #tpu.memory_space<vmem>>, vector<1x1x32xf32>
    %59 = vector.shape_cast %58 : vector<1x1x32xf32> to vector<1x32xf32>
    %c3_51 = arith.constant 3 : index
    %c0_52 = arith.constant 0 : index
    %c0_53 = arith.constant 0 : index
    %60 = vector.load %arg6[%c3_51, %c0_52, %c0_53] : memref<14x1x32xf32, #tpu.memory_space<vmem>>, vector<1x1x32xf32>
    %61 = vector.shape_cast %60 : vector<1x1x32xf32> to vector<1x32xf32>
    %cst_54 = arith.constant dense<0.000000e+00> : vector<8xf32>
    %62 = vector.multi_reduction <add>, %57, %cst_54 [1] : vector<8x32xf32> to vector<8xf32>
    %63 = vector.shape_cast %62 : vector<8xf32> to vector<8x1xf32>
    %cst_55 = arith.constant 3.200000e+01 : f32
    %64 = vector.broadcast %cst_55 : f32 to vector<8x1xf32>
    %65 = arith.divf %63, %64 : vector<8x1xf32>
    %66 = vector.broadcast %65 : vector<8x1xf32> to vector<8x32xf32>
    %67 = arith.subf %57, %66 : vector<8x32xf32>
    %68 = arith.mulf %67, %67 : vector<8x32xf32>
    %cst_56 = arith.constant dense<0.000000e+00> : vector<8xf32>
    %69 = vector.multi_reduction <add>, %68, %cst_56 [1] : vector<8x32xf32> to vector<8xf32>
    %70 = vector.shape_cast %69 : vector<8xf32> to vector<8x1xf32>
    %cst_57 = arith.constant 3.200000e+01 : f32
    %71 = vector.broadcast %cst_57 : f32 to vector<8x1xf32>
    %72 = arith.divf %70, %71 : vector<8x1xf32>
    %cst_58 = arith.constant 9.99999974E-6 : f32
    %73 = vector.broadcast %cst_58 : f32 to vector<8x1xf32>
    %74 = arith.addf %72, %73 : vector<8x1xf32>
    %75 = math.rsqrt %74 : vector<8x1xf32>
    %76 = vector.broadcast %75 : vector<8x1xf32> to vector<8x32xf32>
    %77 = arith.mulf %67, %76 : vector<8x32xf32>
    %78 = vector.broadcast %59 : vector<1x32xf32> to vector<8x32xf32>
    %79 = arith.mulf %77, %78 : vector<8x32xf32>
    %80 = vector.broadcast %61 : vector<1x32xf32> to vector<8x32xf32>
    %81 = arith.addf %79, %80 : vector<8x32xf32>
    %82 = arith.truncf %81 : vector<8x32xf32> to vector<8x32xbf16>
    %c0_59 = arith.constant 0 : index
    %c0_60 = arith.constant 0 : index
    %c0_61 = arith.constant 0 : index
    %c0_62 = arith.constant 0 : index
    %83 = vector.load %arg4[%c0_59, %c0_60, %c0_61, %c0_62] : memref<2x2x32x64xbf16, #tpu.memory_space<vmem>>, vector<1x1x32x64xbf16>
    %84 = vector.shape_cast %83 : vector<1x1x32x64xbf16> to vector<32x64xbf16>
    %cst_63 = arith.constant dense<0.000000e+00> : vector<8x64xf32>
    %85 = tpu.matmul %82, %84, %cst_63 {dimension_numbers = #tpu.dot_dimension_numbers<[1], [0], [0], [1], [0, 0, 1, 1], [], []>} : vector<8x32xbf16>, vector<32x64xbf16>, vector<8x64xf32> -> vector<8x64xf32>
    %c0_64 = arith.constant 0 : index
    %c0_65 = arith.constant 0 : index
    %c0_66 = arith.constant 0 : index
    %86 = vector.load %arg7[%c0_64, %c0_65, %c0_66] : memref<2x1x64xf32, #tpu.memory_space<vmem>>, vector<1x1x64xf32>
    %87 = vector.shape_cast %86 : vector<1x1x64xf32> to vector<1x64xf32>
    %88 = vector.broadcast %87 : vector<1x64xf32> to vector<8x64xf32>
    %89 = arith.addf %85, %88 : vector<8x64xf32>
    %cst_67 = arith.constant 0.000000e+00 : f32
    %90 = vector.broadcast %cst_67 : f32 to vector<8x64xf32>
    %91 = arith.maximumf %89, %90 : vector<8x64xf32>
    %92 = arith.truncf %91 : vector<8x64xf32> to vector<8x64xbf16>
    %c0_68 = arith.constant 0 : index
    %c1_69 = arith.constant 1 : index
    %c0_70 = arith.constant 0 : index
    %c0_71 = arith.constant 0 : index
    %93 = vector.load %arg4[%c0_68, %c1_69, %c0_70, %c0_71] : memref<2x2x32x64xbf16, #tpu.memory_space<vmem>>, vector<1x1x32x64xbf16>
    %94 = vector.shape_cast %93 : vector<1x1x32x64xbf16> to vector<32x64xbf16>
    %cst_72 = arith.constant dense<0.000000e+00> : vector<8x32xf32>
    %95 = tpu.matmul %92, %94, %cst_72 {dimension_numbers = #tpu.dot_dimension_numbers<[1], [1], [0], [0], [0, 0, 1, 0], [], []>} : vector<8x64xbf16>, vector<32x64xbf16>, vector<8x32xf32> -> vector<8x32xf32>
    %c1_73 = arith.constant 1 : index
    %c0_74 = arith.constant 0 : index
    %c0_75 = arith.constant 0 : index
    %96 = vector.load %arg6[%c1_73, %c0_74, %c0_75] : memref<14x1x32xf32, #tpu.memory_space<vmem>>, vector<1x1x32xf32>
    %97 = vector.shape_cast %96 : vector<1x1x32xf32> to vector<1x32xf32>
    %98 = vector.broadcast %97 : vector<1x32xf32> to vector<8x32xf32>
    %99 = arith.addf %95, %98 : vector<8x32xf32>
    %100 = arith.addf %81, %99 : vector<8x32xf32>
    %c4 = arith.constant 4 : index
    %c0_76 = arith.constant 0 : index
    %c0_77 = arith.constant 0 : index
    %101 = vector.load %arg6[%c4, %c0_76, %c0_77] : memref<14x1x32xf32, #tpu.memory_space<vmem>>, vector<1x1x32xf32>
    %102 = vector.shape_cast %101 : vector<1x1x32xf32> to vector<1x32xf32>
    %c5 = arith.constant 5 : index
    %c0_78 = arith.constant 0 : index
    %c0_79 = arith.constant 0 : index
    %103 = vector.load %arg6[%c5, %c0_78, %c0_79] : memref<14x1x32xf32, #tpu.memory_space<vmem>>, vector<1x1x32xf32>
    %104 = vector.shape_cast %103 : vector<1x1x32xf32> to vector<1x32xf32>
    %cst_80 = arith.constant dense<0.000000e+00> : vector<8xf32>
    %105 = vector.multi_reduction <add>, %100, %cst_80 [1] : vector<8x32xf32> to vector<8xf32>
    %106 = vector.shape_cast %105 : vector<8xf32> to vector<8x1xf32>
    %cst_81 = arith.constant 3.200000e+01 : f32
    %107 = vector.broadcast %cst_81 : f32 to vector<8x1xf32>
    %108 = arith.divf %106, %107 : vector<8x1xf32>
    %109 = vector.broadcast %108 : vector<8x1xf32> to vector<8x32xf32>
    %110 = arith.subf %100, %109 : vector<8x32xf32>
    %111 = arith.mulf %110, %110 : vector<8x32xf32>
    %cst_82 = arith.constant dense<0.000000e+00> : vector<8xf32>
    %112 = vector.multi_reduction <add>, %111, %cst_82 [1] : vector<8x32xf32> to vector<8xf32>
    %113 = vector.shape_cast %112 : vector<8xf32> to vector<8x1xf32>
    %cst_83 = arith.constant 3.200000e+01 : f32
    %114 = vector.broadcast %cst_83 : f32 to vector<8x1xf32>
    %115 = arith.divf %113, %114 : vector<8x1xf32>
    %cst_84 = arith.constant 9.99999974E-6 : f32
    %116 = vector.broadcast %cst_84 : f32 to vector<8x1xf32>
    %117 = arith.addf %115, %116 : vector<8x1xf32>
    %118 = math.rsqrt %117 : vector<8x1xf32>
    %119 = vector.broadcast %118 : vector<8x1xf32> to vector<8x32xf32>
    %120 = arith.mulf %110, %119 : vector<8x32xf32>
    %121 = vector.broadcast %102 : vector<1x32xf32> to vector<8x32xf32>
    %122 = arith.mulf %120, %121 : vector<8x32xf32>
    %123 = vector.broadcast %104 : vector<1x32xf32> to vector<8x32xf32>
    %124 = arith.addf %122, %123 : vector<8x32xf32>
    %125 = arith.addf %124, %3 : vector<8x32xf32>
    %126 = arith.truncf %125 : vector<8x32xf32> to vector<8x32xbf16>
    %127 = vector.shape_cast %126 : vector<8x32xbf16> to vector<1x8x32xbf16>
    %128 = vector.broadcast %127 : vector<1x8x32xbf16> to vector<4x8x32xbf16>
    %129 = arith.truncf %124 : vector<8x32xf32> to vector<8x32xbf16>
    %130 = vector.shape_cast %129 : vector<8x32xbf16> to vector<1x8x32xbf16>
    %131 = vector.broadcast %130 : vector<1x8x32xbf16> to vector<4x8x32xbf16>
    %c1_85 = arith.constant 1 : index
    %c0_86 = arith.constant 0 : index
    %c0_87 = arith.constant 0 : index
    %c0_88 = arith.constant 0 : index
    %c0_89 = arith.constant 0 : index
    %132 = vector.load %arg3[%c1_85, %c0_86, %c0_87, %c0_88, %c0_89] : memref<2x4x4x32x8xbf16, #tpu.memory_space<vmem>>, vector<1x1x4x32x8xbf16>
    %133 = vector.shape_cast %132 : vector<1x1x4x32x8xbf16> to vector<4x32x8xbf16>
    %cst_90 = arith.constant dense<0.000000e+00> : vector<4x8x8xf32>
    %134 = tpu.matmul %128, %133, %cst_90 {dimension_numbers = #tpu.dot_dimension_numbers<[2], [1], [1], [2], [0, 0, 0, 1, 1, 2], [0], [0]>} : vector<4x8x32xbf16>, vector<4x32x8xbf16>, vector<4x8x8xf32> -> vector<4x8x8xf32>
    %c1_91 = arith.constant 1 : index
    %c0_92 = arith.constant 0 : index
    %c0_93 = arith.constant 0 : index
    %c0_94 = arith.constant 0 : index
    %c0_95 = arith.constant 0 : index
    %135 = vector.load %arg5[%c1_91, %c0_92, %c0_93, %c0_94, %c0_95] : memref<2x3x4x1x8xf32, #tpu.memory_space<vmem>>, vector<1x1x4x1x8xf32>
    %136 = vector.shape_cast %135 : vector<1x1x4x1x8xf32> to vector<4x1x8xf32>
    %137 = vector.broadcast %136 : vector<4x1x8xf32> to vector<4x8x8xf32>
    %138 = arith.addf %134, %137 : vector<4x8x8xf32>
    %c1_96 = arith.constant 1 : index
    %c1_97 = arith.constant 1 : index
    %c0_98 = arith.constant 0 : index
    %c0_99 = arith.constant 0 : index
    %c0_100 = arith.constant 0 : index
    %139 = vector.load %arg3[%c1_96, %c1_97, %c0_98, %c0_99, %c0_100] : memref<2x4x4x32x8xbf16, #tpu.memory_space<vmem>>, vector<1x1x4x32x8xbf16>
    %140 = vector.shape_cast %139 : vector<1x1x4x32x8xbf16> to vector<4x32x8xbf16>
    %cst_101 = arith.constant dense<0.000000e+00> : vector<4x8x8xf32>
    %141 = tpu.matmul %128, %140, %cst_101 {dimension_numbers = #tpu.dot_dimension_numbers<[2], [1], [1], [2], [0, 0, 0, 1, 1, 2], [0], [0]>} : vector<4x8x32xbf16>, vector<4x32x8xbf16>, vector<4x8x8xf32> -> vector<4x8x8xf32>
    %c1_102 = arith.constant 1 : index
    %c1_103 = arith.constant 1 : index
    %c0_104 = arith.constant 0 : index
    %c0_105 = arith.constant 0 : index
    %c0_106 = arith.constant 0 : index
    %142 = vector.load %arg5[%c1_102, %c1_103, %c0_104, %c0_105, %c0_106] : memref<2x3x4x1x8xf32, #tpu.memory_space<vmem>>, vector<1x1x4x1x8xf32>
    %143 = vector.shape_cast %142 : vector<1x1x4x1x8xf32> to vector<4x1x8xf32>
    %144 = vector.broadcast %143 : vector<4x1x8xf32> to vector<4x8x8xf32>
    %145 = arith.addf %141, %144 : vector<4x8x8xf32>
    %c1_107 = arith.constant 1 : index
    %c2_108 = arith.constant 2 : index
    %c0_109 = arith.constant 0 : index
    %c0_110 = arith.constant 0 : index
    %c0_111 = arith.constant 0 : index
    %146 = vector.load %arg3[%c1_107, %c2_108, %c0_109, %c0_110, %c0_111] : memref<2x4x4x32x8xbf16, #tpu.memory_space<vmem>>, vector<1x1x4x32x8xbf16>
    %147 = vector.shape_cast %146 : vector<1x1x4x32x8xbf16> to vector<4x32x8xbf16>
    %cst_112 = arith.constant dense<0.000000e+00> : vector<4x8x8xf32>
    %148 = tpu.matmul %131, %147, %cst_112 {dimension_numbers = #tpu.dot_dimension_numbers<[2], [1], [1], [2], [0, 0, 0, 1, 1, 2], [0], [0]>} : vector<4x8x32xbf16>, vector<4x32x8xbf16>, vector<4x8x8xf32> -> vector<4x8x8xf32>
    %c1_113 = arith.constant 1 : index
    %c2_114 = arith.constant 2 : index
    %c0_115 = arith.constant 0 : index
    %c0_116 = arith.constant 0 : index
    %c0_117 = arith.constant 0 : index
    %149 = vector.load %arg5[%c1_113, %c2_114, %c0_115, %c0_116, %c0_117] : memref<2x3x4x1x8xf32, #tpu.memory_space<vmem>>, vector<1x1x4x1x8xf32>
    %150 = vector.shape_cast %149 : vector<1x1x4x1x8xf32> to vector<4x1x8xf32>
    %151 = vector.broadcast %150 : vector<4x1x8xf32> to vector<4x8x8xf32>
    %152 = arith.addf %148, %151 : vector<4x8x8xf32>
    %153 = arith.truncf %138 : vector<4x8x8xf32> to vector<4x8x8xbf16>
    %154 = arith.truncf %145 : vector<4x8x8xf32> to vector<4x8x8xbf16>
    %cst_118 = arith.constant dense<0.000000e+00> : vector<4x8x8xf32>
    %155 = tpu.matmul %153, %154, %cst_118 {dimension_numbers = #tpu.dot_dimension_numbers<[2], [2], [1], [1], [0, 0, 0, 1, 1, 1], [0], [0]>} : vector<4x8x8xbf16>, vector<4x8x8xbf16>, vector<4x8x8xf32> -> vector<4x8x8xf32>
    %cst_119 = arith.constant dense<0xFF800000> : vector<4x8xf32>
    %156 = vector.multi_reduction <maximumf>, %155, %cst_119 [2] : vector<4x8x8xf32> to vector<4x8xf32>
    %157 = vector.shape_cast %156 : vector<4x8xf32> to vector<4x8x1xf32>
    %158 = vector.broadcast %157 : vector<4x8x1xf32> to vector<4x8x8xf32>
    %159 = arith.subf %155, %158 : vector<4x8x8xf32>
    %160 = math.exp %159 : vector<4x8x8xf32>
    %cst_120 = arith.constant dense<0.000000e+00> : vector<4x8xf32>
    %161 = vector.multi_reduction <add>, %160, %cst_120 [2] : vector<4x8x8xf32> to vector<4x8xf32>
    %162 = vector.shape_cast %161 : vector<4x8xf32> to vector<4x8x1xf32>
    %163 = tpu.reciprocal %162 : vector<4x8x1xf32> -> vector<4x8x1xf32>
    %164 = vector.broadcast %163 : vector<4x8x1xf32> to vector<4x8x8xf32>
    %165 = arith.mulf %160, %164 : vector<4x8x8xf32>
    %166 = arith.truncf %165 : vector<4x8x8xf32> to vector<4x8x8xbf16>
    %167 = arith.truncf %152 : vector<4x8x8xf32> to vector<4x8x8xbf16>
    %cst_121 = arith.constant dense<0.000000e+00> : vector<4x8x8xf32>
    %168 = tpu.matmul %166, %167, %cst_121 {dimension_numbers = #tpu.dot_dimension_numbers<[2], [1], [1], [2], [0, 0, 0, 1, 1, 2], [0], [0]>} : vector<4x8x8xbf16>, vector<4x8x8xbf16>, vector<4x8x8xf32> -> vector<4x8x8xf32>
    %169 = arith.truncf %168 : vector<4x8x8xf32> to vector<4x8x8xbf16>
    %c1_122 = arith.constant 1 : index
    %c3_123 = arith.constant 3 : index
    %c0_124 = arith.constant 0 : index
    %c0_125 = arith.constant 0 : index
    %c0_126 = arith.constant 0 : index
    %170 = vector.load %arg3[%c1_122, %c3_123, %c0_124, %c0_125, %c0_126] : memref<2x4x4x32x8xbf16, #tpu.memory_space<vmem>>, vector<1x1x4x32x8xbf16>
    %171 = vector.shape_cast %170 : vector<1x1x4x32x8xbf16> to vector<4x32x8xbf16>
    %cst_127 = arith.constant dense<0.000000e+00> : vector<4x8x32xf32>
    %172 = tpu.matmul %169, %171, %cst_127 {dimension_numbers = #tpu.dot_dimension_numbers<[2], [2], [1], [1], [0, 0, 0, 1, 1, 1], [0], [0]>} : vector<4x8x8xbf16>, vector<4x32x8xbf16>, vector<4x8x32xf32> -> vector<4x8x32xf32>
    %cst_128 = arith.constant dense<0.000000e+00> : vector<8x32xf32>
    %173 = vector.multi_reduction <add>, %172, %cst_128 [0] : vector<4x8x32xf32> to vector<8x32xf32>
    %c6 = arith.constant 6 : index
    %c0_129 = arith.constant 0 : index
    %c0_130 = arith.constant 0 : index
    %174 = vector.load %arg6[%c6, %c0_129, %c0_130] : memref<14x1x32xf32, #tpu.memory_space<vmem>>, vector<1x1x32xf32>
    %175 = vector.shape_cast %174 : vector<1x1x32xf32> to vector<1x32xf32>
    %176 = vector.broadcast %175 : vector<1x32xf32> to vector<8x32xf32>
    %177 = arith.addf %173, %176 : vector<8x32xf32>
    %178 = arith.addf %124, %177 : vector<8x32xf32>
    %c8 = arith.constant 8 : index
    %c0_131 = arith.constant 0 : index
    %c0_132 = arith.constant 0 : index
    %179 = vector.load %arg6[%c8, %c0_131, %c0_132] : memref<14x1x32xf32, #tpu.memory_space<vmem>>, vector<1x1x32xf32>
    %180 = vector.shape_cast %179 : vector<1x1x32xf32> to vector<1x32xf32>
    %c9 = arith.constant 9 : index
    %c0_133 = arith.constant 0 : index
    %c0_134 = arith.constant 0 : index
    %181 = vector.load %arg6[%c9, %c0_133, %c0_134] : memref<14x1x32xf32, #tpu.memory_space<vmem>>, vector<1x1x32xf32>
    %182 = vector.shape_cast %181 : vector<1x1x32xf32> to vector<1x32xf32>
    %cst_135 = arith.constant dense<0.000000e+00> : vector<8xf32>
    %183 = vector.multi_reduction <add>, %178, %cst_135 [1] : vector<8x32xf32> to vector<8xf32>
    %184 = vector.shape_cast %183 : vector<8xf32> to vector<8x1xf32>
    %cst_136 = arith.constant 3.200000e+01 : f32
    %185 = vector.broadcast %cst_136 : f32 to vector<8x1xf32>
    %186 = arith.divf %184, %185 : vector<8x1xf32>
    %187 = vector.broadcast %186 : vector<8x1xf32> to vector<8x32xf32>
    %188 = arith.subf %178, %187 : vector<8x32xf32>
    %189 = arith.mulf %188, %188 : vector<8x32xf32>
    %cst_137 = arith.constant dense<0.000000e+00> : vector<8xf32>
    %190 = vector.multi_reduction <add>, %189, %cst_137 [1] : vector<8x32xf32> to vector<8xf32>
    %191 = vector.shape_cast %190 : vector<8xf32> to vector<8x1xf32>
    %cst_138 = arith.constant 3.200000e+01 : f32
    %192 = vector.broadcast %cst_138 : f32 to vector<8x1xf32>
    %193 = arith.divf %191, %192 : vector<8x1xf32>
    %cst_139 = arith.constant 9.99999974E-6 : f32
    %194 = vector.broadcast %cst_139 : f32 to vector<8x1xf32>
    %195 = arith.addf %193, %194 : vector<8x1xf32>
    %196 = math.rsqrt %195 : vector<8x1xf32>
    %197 = vector.broadcast %196 : vector<8x1xf32> to vector<8x32xf32>
    %198 = arith.mulf %188, %197 : vector<8x32xf32>
    %199 = vector.broadcast %180 : vector<1x32xf32> to vector<8x32xf32>
    %200 = arith.mulf %198, %199 : vector<8x32xf32>
    %201 = vector.broadcast %182 : vector<1x32xf32> to vector<8x32xf32>
    %202 = arith.addf %200, %201 : vector<8x32xf32>
    %203 = arith.truncf %202 : vector<8x32xf32> to vector<8x32xbf16>
    %c1_140 = arith.constant 1 : index
    %c0_141 = arith.constant 0 : index
    %c0_142 = arith.constant 0 : index
    %c0_143 = arith.constant 0 : index
    %204 = vector.load %arg4[%c1_140, %c0_141, %c0_142, %c0_143] : memref<2x2x32x64xbf16, #tpu.memory_space<vmem>>, vector<1x1x32x64xbf16>
    %205 = vector.shape_cast %204 : vector<1x1x32x64xbf16> to vector<32x64xbf16>
    %cst_144 = arith.constant dense<0.000000e+00> : vector<8x64xf32>
    %206 = tpu.matmul %203, %205, %cst_144 {dimension_numbers = #tpu.dot_dimension_numbers<[1], [0], [0], [1], [0, 0, 1, 1], [], []>} : vector<8x32xbf16>, vector<32x64xbf16>, vector<8x64xf32> -> vector<8x64xf32>
    %c1_145 = arith.constant 1 : index
    %c0_146 = arith.constant 0 : index
    %c0_147 = arith.constant 0 : index
    %207 = vector.load %arg7[%c1_145, %c0_146, %c0_147] : memref<2x1x64xf32, #tpu.memory_space<vmem>>, vector<1x1x64xf32>
    %208 = vector.shape_cast %207 : vector<1x1x64xf32> to vector<1x64xf32>
    %209 = vector.broadcast %208 : vector<1x64xf32> to vector<8x64xf32>
    %210 = arith.addf %206, %209 : vector<8x64xf32>
    %cst_148 = arith.constant 0.000000e+00 : f32
    %211 = vector.broadcast %cst_148 : f32 to vector<8x64xf32>
    %212 = arith.maximumf %210, %211 : vector<8x64xf32>
    %213 = arith.truncf %212 : vector<8x64xf32> to vector<8x64xbf16>
    %c1_149 = arith.constant 1 : index
    %c1_150 = arith.constant 1 : index
    %c0_151 = arith.constant 0 : index
    %c0_152 = arith.constant 0 : index
    %214 = vector.load %arg4[%c1_149, %c1_150, %c0_151, %c0_152] : memref<2x2x32x64xbf16, #tpu.memory_space<vmem>>, vector<1x1x32x64xbf16>
    %215 = vector.shape_cast %214 : vector<1x1x32x64xbf16> to vector<32x64xbf16>
    %cst_153 = arith.constant dense<0.000000e+00> : vector<8x32xf32>
    %216 = tpu.matmul %213, %215, %cst_153 {dimension_numbers = #tpu.dot_dimension_numbers<[1], [1], [0], [0], [0, 0, 1, 0], [], []>} : vector<8x64xbf16>, vector<32x64xbf16>, vector<8x32xf32> -> vector<8x32xf32>
    %c7 = arith.constant 7 : index
    %c0_154 = arith.constant 0 : index
    %c0_155 = arith.constant 0 : index
    %217 = vector.load %arg6[%c7, %c0_154, %c0_155] : memref<14x1x32xf32, #tpu.memory_space<vmem>>, vector<1x1x32xf32>
    %218 = vector.shape_cast %217 : vector<1x1x32xf32> to vector<1x32xf32>
    %219 = vector.broadcast %218 : vector<1x32xf32> to vector<8x32xf32>
    %220 = arith.addf %216, %219 : vector<8x32xf32>
    %221 = arith.addf %202, %220 : vector<8x32xf32>
    %c10 = arith.constant 10 : index
    %c0_156 = arith.constant 0 : index
    %c0_157 = arith.constant 0 : index
    %222 = vector.load %arg6[%c10, %c0_156, %c0_157] : memref<14x1x32xf32, #tpu.memory_space<vmem>>, vector<1x1x32xf32>
    %223 = vector.shape_cast %222 : vector<1x1x32xf32> to vector<1x32xf32>
    %c11 = arith.constant 11 : index
    %c0_158 = arith.constant 0 : index
    %c0_159 = arith.constant 0 : index
    %224 = vector.load %arg6[%c11, %c0_158, %c0_159] : memref<14x1x32xf32, #tpu.memory_space<vmem>>, vector<1x1x32xf32>
    %225 = vector.shape_cast %224 : vector<1x1x32xf32> to vector<1x32xf32>
    %cst_160 = arith.constant dense<0.000000e+00> : vector<8xf32>
    %226 = vector.multi_reduction <add>, %221, %cst_160 [1] : vector<8x32xf32> to vector<8xf32>
    %227 = vector.shape_cast %226 : vector<8xf32> to vector<8x1xf32>
    %cst_161 = arith.constant 3.200000e+01 : f32
    %228 = vector.broadcast %cst_161 : f32 to vector<8x1xf32>
    %229 = arith.divf %227, %228 : vector<8x1xf32>
    %230 = vector.broadcast %229 : vector<8x1xf32> to vector<8x32xf32>
    %231 = arith.subf %221, %230 : vector<8x32xf32>
    %232 = arith.mulf %231, %231 : vector<8x32xf32>
    %cst_162 = arith.constant dense<0.000000e+00> : vector<8xf32>
    %233 = vector.multi_reduction <add>, %232, %cst_162 [1] : vector<8x32xf32> to vector<8xf32>
    %234 = vector.shape_cast %233 : vector<8xf32> to vector<8x1xf32>
    %cst_163 = arith.constant 3.200000e+01 : f32
    %235 = vector.broadcast %cst_163 : f32 to vector<8x1xf32>
    %236 = arith.divf %234, %235 : vector<8x1xf32>
    %cst_164 = arith.constant 9.99999974E-6 : f32
    %237 = vector.broadcast %cst_164 : f32 to vector<8x1xf32>
    %238 = arith.addf %236, %237 : vector<8x1xf32>
    %239 = math.rsqrt %238 : vector<8x1xf32>
    %240 = vector.broadcast %239 : vector<8x1xf32> to vector<8x32xf32>
    %241 = arith.mulf %231, %240 : vector<8x32xf32>
    %242 = vector.broadcast %223 : vector<1x32xf32> to vector<8x32xf32>
    %243 = arith.mulf %241, %242 : vector<8x32xf32>
    %244 = vector.broadcast %225 : vector<1x32xf32> to vector<8x32xf32>
    %245 = arith.addf %243, %244 : vector<8x32xf32>
    %c12 = arith.constant 12 : index
    %c0_165 = arith.constant 0 : index
    %c0_166 = arith.constant 0 : index
    %246 = vector.load %arg6[%c12, %c0_165, %c0_166] : memref<14x1x32xf32, #tpu.memory_space<vmem>>, vector<1x1x32xf32>
    %247 = vector.shape_cast %246 : vector<1x1x32xf32> to vector<1x32xf32>
    %c13 = arith.constant 13 : index
    %c0_167 = arith.constant 0 : index
    %c0_168 = arith.constant 0 : index
    %248 = vector.load %arg6[%c13, %c0_167, %c0_168] : memref<14x1x32xf32, #tpu.memory_space<vmem>>, vector<1x1x32xf32>
    %249 = vector.shape_cast %248 : vector<1x1x32xf32> to vector<1x32xf32>
    %cst_169 = arith.constant dense<0.000000e+00> : vector<8xf32>
    %250 = vector.multi_reduction <add>, %245, %cst_169 [1] : vector<8x32xf32> to vector<8xf32>
    %251 = vector.shape_cast %250 : vector<8xf32> to vector<8x1xf32>
    %cst_170 = arith.constant 3.200000e+01 : f32
    %252 = vector.broadcast %cst_170 : f32 to vector<8x1xf32>
    %253 = arith.divf %251, %252 : vector<8x1xf32>
    %254 = vector.broadcast %253 : vector<8x1xf32> to vector<8x32xf32>
    %255 = arith.subf %245, %254 : vector<8x32xf32>
    %256 = arith.mulf %255, %255 : vector<8x32xf32>
    %cst_171 = arith.constant dense<0.000000e+00> : vector<8xf32>
    %257 = vector.multi_reduction <add>, %256, %cst_171 [1] : vector<8x32xf32> to vector<8xf32>
    %258 = vector.shape_cast %257 : vector<8xf32> to vector<8x1xf32>
    %cst_172 = arith.constant 3.200000e+01 : f32
    %259 = vector.broadcast %cst_172 : f32 to vector<8x1xf32>
    %260 = arith.divf %258, %259 : vector<8x1xf32>
    %cst_173 = arith.constant 9.99999974E-6 : f32
    %261 = vector.broadcast %cst_173 : f32 to vector<8x1xf32>
    %262 = arith.addf %260, %261 : vector<8x1xf32>
    %263 = math.rsqrt %262 : vector<8x1xf32>
    %264 = vector.broadcast %263 : vector<8x1xf32> to vector<8x32xf32>
    %265 = arith.mulf %255, %264 : vector<8x32xf32>
    %266 = vector.broadcast %247 : vector<1x32xf32> to vector<8x32xf32>
    %267 = arith.mulf %265, %266 : vector<8x32xf32>
    %268 = vector.broadcast %249 : vector<1x32xf32> to vector<8x32xf32>
    %269 = arith.addf %267, %268 : vector<8x32xf32>
    %c0_174 = arith.constant 0 : index
    %c0_175 = arith.constant 0 : index
    %c0_176 = arith.constant 0 : index
    %270 = vector.load %arg8[%c0_174, %c0_175, %c0_176] : memref<1x8x32xf32, #tpu.memory_space<vmem>>, vector<1x8x32xf32>
    %271 = vector.shape_cast %270 : vector<1x8x32xf32> to vector<8x32xf32>
    %272 = vector.shape_cast %269 : vector<8x32xf32> to vector<1x8x32xf32>
    tpu.vector_store %arg8[%c0_174, %c0_175, %c0_176], %272 {strides = array<i32>} : memref<1x8x32xf32, #tpu.memory_space<vmem>>, vector<1x8x32xf32>,
    return
  }
  func.func @transform_0(%arg0: i32) -> (i32, i32, i32) {
    %c0_i32 = arith.constant 0 : i32
    %c0_i32_0 = arith.constant 0 : i32
    %c0_i32_1 = arith.constant 0 : i32
    return %arg0, %c0_i32, %c0_i32_0 : i32, i32, i32
  }
  func.func @transform_1(%arg0: i32) -> (i32, i32, i32) {
    %c0_i32 = arith.constant 0 : i32
    %c0_i32_0 = arith.constant 0 : i32
    %c0_i32_1 = arith.constant 0 : i32
    return %arg0, %c0_i32, %c0_i32_0 : i32, i32, i32
  }
  func.func @transform_2(%arg0: i32) -> (i32, i32, i32, i32, i32) {
    %c0_i32 = arith.constant 0 : i32
    %c0_i32_0 = arith.constant 0 : i32
    %c0_i32_1 = arith.constant 0 : i32
    %c0_i32_2 = arith.constant 0 : i32
    %c0_i32_3 = arith.constant 0 : i32
    %c0_i32_4 = arith.constant 0 : i32
    return %c0_i32, %c0_i32_0, %c0_i32_1, %c0_i32_2, %c0_i32_3 : i32, i32, i32, i32, i32
  }
  func.func @transform_3(%arg0: i32) -> (i32, i32, i32, i32) {
    %c0_i32 = arith.constant 0 : i32
    %c0_i32_0 = arith.constant 0 : i32
    %c0_i32_1 = arith.constant 0 : i32
    %c0_i32_2 = arith.constant 0 : i32
    %c0_i32_3 = arith.constant 0 : i32
    return %c0_i32, %c0_i32_0, %c0_i32_1, %c0_i32_2 : i32, i32, i32, i32
  }
  func.func @transform_4(%arg0: i32) -> (i32, i32, i32, i32, i32) {
    %c0_i32 = arith.constant 0 : i32
    %c0_i32_0 = arith.constant 0 : i32
    %c0_i32_1 = arith.constant 0 : i32
    %c0_i32_2 = arith.constant 0 : i32
    %c0_i32_3 = arith.constant 0 : i32
    %c0_i32_4 = arith.constant 0 : i32
    return %c0_i32, %c0_i32_0, %c0_i32_1, %c0_i32_2, %c0_i32_3 : i32, i32, i32, i32, i32
  }
  func.func @transform_5(%arg0: i32) -> (i32, i32, i32) {
    %c0_i32 = arith.constant 0 : i32
    %c0_i32_0 = arith.constant 0 : i32
    %c0_i32_1 = arith.constant 0 : i32
    %c0_i32_2 = arith.constant 0 : i32
    return %c0_i32, %c0_i32_0, %c0_i32_1 : i32, i32, i32
  }
  func.func @transform_6(%arg0: i32) -> (i32, i32, i32) {
    %c0_i32 = arith.constant 0 : i32
    %c0_i32_0 = arith.constant 0 : i32
    %c0_i32_1 = arith.constant 0 : i32
    %c0_i32_2 = arith.constant 0 : i32
    return %c0_i32, %c0_i32_0, %c0_i32_1 : i32, i32, i32
  }
  func.func @transform_7(%arg0: i32) -> (i32, i32, i32) {
    %c0_i32 = arith.constant 0 : i32
    %c0_i32_0 = arith.constant 0 : i32
    %c0_i32_1 = arith.constant 0 : i32
    return %arg0, %c0_i32, %c0_i32_0 : i32, i32, i32
  }
}

</mosaic_0001>

<bundles_post_ra>
// kernel: transformer_encoder.1
= control target key start
LH: loop header
LB: loop body
LE: loop exit
PB: predicated region body
PF: predicated region fallthrough
CT: control target
= control target key end

     0   :  { %s4780_s24 = smov 0   ;;  %s5494_s0 = inlined_call_operand.vmem [shape: f32[2,8,32], index: 0, kind: input, shape index: {}]   ;;  %s5495_s1 = inlined_call_operand.vmem [shape: f32[2,8,32], index: 1, kind: input, shape index: {}]   ;;  %s5496_s2 = inlined_call_operand.vmem [shape: bf16[2,4,4,32,8], index: 2, kind: input, shape index: {}]   ;;  %s5497_s3 = inlined_call_operand.vmem [shape: bf16[2,2,32,64], index: 3, kind: input, shape index: {}]   ;;  %s5498_s4 = inlined_call_operand.vmem [shape: f32[2,3,4,1,8], index: 4, kind: input, shape index: {}]   ;;  %s5499_s5 = inlined_call_operand.vmem [shape: f32[14,1,32], index: 5, kind: input, shape index: {}]   ;;  %s5500_s6 = inlined_call_operand.vmem [shape: f32[2,1,64], index: 6, kind: input, shape index: {}]   ;;  %s5501_s7 = inlined_call_operand.vmem [shape: f32[2,8,32], index: 7, kind: output, shape index: {}]  }
   0x1 LB: > { %s3749_s25 = sadd.s32 4294967295, %s4736_s24   ;;  %p3753_p0 = scmp.ge.s32.totalorder %s4736_s24, 1  ;;  %s4736_s24 = sphi %s4780_s24, %s17_s24  }
   0x2   : > { %p245_p1 = scmp.lt.s32.totalorder %s4736_s24, 3 }
   0x4   : > { %p246_p2 = pnand %p3753_p0, %p245_p1 }
   0x5   : > { %v4615_v0 = vld [vmem:[%s5496_s2] sm:$0xff] (!%p246_p2)   ;;  %v4738_v1 = vmov (!%p246_p2), 0.0   ;;  %v4617_v3 = vld [vmem:[%s5496_s2 + $0x8] sm:$0xff] (!%p246_p2)   ;;  %vm4739_vm0 = vmmov (!%p246_p2), 0   ;;  %p279_p3 = scmp.lt.s32.totalorder (!%p246_p2), %s3749_s25, 1  ;;  %v4619_v8 = vld [vmem:[%s5496_s2 + $0x10] sm:$0xff] (!%p246_p2)  }
   0x6   : > { %249 = sbr.rel (%p246_p2) target bundleno = 4914 (0x1332), region = 48  ;;  %4221 = vmatprep.subr.bf16.mxu1 (!%p246_p2), %v4738_v1  ;;  %4237 = vmatprep.subr.bf16.mxu0 (!%p246_p2), %v4738_v1  ;;  %v4616_v2 = vld [vmem:[%s5496_s2 + $0x20] sm:$0xff] (!%p246_p2)   ;;  %v4618_v4 = vld [vmem:[%s5496_s2 + $0x28] sm:$0xff] (!%p246_p2)   ;;  %vm353_vm1 = vcmask (!%p246_p2), 261120   ;;  %v4621_v11 = vld [vmem:[%s5496_s2 + $0x18] sm:$0xff] (!%p246_p2)   ;;  %vm1072_vm2 = vcmask (!%p246_p2), 64512  }
   0x7   : > { %4222 = vmatpush3.bf16.msra.mxu1 (!%p246_p2), %v4615_v0  ;;  %4225 = vmatprep.mubr.msk.bf16.mxu1 (!%p246_p2), %vm4739_vm0, %v4738_v1  ;;  %v4620_v9 = vld [vmem:[%s5496_s2 + $0x40] sm:$0xff] (!%p246_p2)   ;;  %v4622_v12 = vld [vmem:[%s5496_s2 + $0x48] sm:$0xff] (!%p246_p2)   ;;  %v4623_v13 = vld [vmem:[%s5496_s2 + $0x30] sm:$0xff] (!%p246_p2)   ;;  %vm1312_vm3 = vcmask (!%p246_p2), 1043456   ;;  %vm1891_vm4 = vcmask (!%p246_p2), 523264  }
   0x8   : > { %4238 = vmatpush3.bf16.msra.mxu0 (!%p246_p2), %v4616_v2  ;;  %4223 = vmatprep.subr.bf16.mxu1 (!%p246_p2), %v4738_v1  ;;  %v4624_v14 = vld [vmem:[%s5496_s2 + $0x60] sm:$0xff] (!%p246_p2)   ;;  %v4625_v15 = vld [vmem:[%s5496_s2 + $0x38] sm:$0xff] (!%p246_p2)   ;;  %v4626_v16 = vld [vmem:[%s5496_s2 + $0x68] sm:$0xff] (!%p246_p2)  }
   0x9   : > { %4239 = vmatprep.subr.bf16.mxu0 (!%p246_p2), %v4738_v1  ;;  %4241 = vmatprep.mubr.msk.bf16.mxu0 (!%p246_p2), %vm4739_vm0, %v4738_v1  ;;  %v4627_v17 = vld [vmem:[%s5496_s2 + $0x50] sm:$0xff] (!%p246_p2)   ;;  %v4631_v18 = vld [vmem:[%s5496_s2 + $0x80] sm:$0xff] (!%p246_p2)   ;;  %v4628_v19 = vld [vmem:[%s5496_s2 + $0x58] sm:$0xff] (!%p246_p2)  }
   0xa   : > { %v4632_v20 = vld [vmem:[%s5496_s2 + $0x88] sm:$0xff] (!%p246_p2)   ;;  %v4629_v21 = vld [vmem:[%s5496_s2 + $0x70] sm:$0xff] (!%p246_p2)   ;;  %v4630_v22 = vld [vmem:[%s5496_s2 + $0x78] sm:$0xff] (!%p246_p2)  }
   0xb   : > { %4224 = vmatpush3.bf16.msra.mxu1 (!%p246_p2), %v4617_v3  ;;  %v4633_v24 = vld [vmem:[%s5496_s2 + $0xa0] sm:$0xff] (!%p246_p2)   ;;  %v4634_v25 = vld [vmem:[%s5496_s2 + $0xa8] sm:$0xff] (!%p246_p2)   ;;  %v4635_v26 = vld [vmem:[%s5496_s2 + $0x90] sm:$0xff] (!%p246_p2)  }
   0xc   : > { %4240 = vmatpush3.bf16.msra.mxu0 (!%p246_p2), %v4618_v4  ;;  %4229 = vmatprep.subr.bf16.mxu1 (!%p246_p2), %v4738_v1  ;;  %v4636_v27 = vld [vmem:[%s5496_s2 + $0x98] sm:$0xff] (!%p246_p2)   ;;  %v4637_v28 = vld [vmem:[%s5496_s2 + $0xb0] sm:$0xff] (!%p246_p2)   ;;  %v3793_v38 = vld [vmem:[%s5498_s4 + $0x4] ss:$0 sm:$0xff] (!%p246_p2) }
   0xd   : > { %s5503_s25 = smov (!%p279_p3, %s3749_s25), 1  ;;  %4253 = vmatprep.subr.bf16.mxu0 %v4738_v1  ;;  %v4638_v29 = vld [vmem:[%s5496_s2 + $0xb8] sm:$0xff]   ;;  %v3757_v49 = vld [vmem:[%s5498_s4] ss:$0 sm:$0xff]  ;;  %v3795_v51 = vld [vmem:[%s5498_s4 + $0x6] ss:$0 sm:$0xff] }
   0xe   : > { %s4808_s11 = sshll.u32 %s5503_s25, 3  ;;  %v3759_v0 = vld [vmem:[%s5498_s4 + $0x2] ss:$0 sm:$0xff]  ;;  %v3794_v3 = vld [vmem:[%s5498_s4 + $0x5] ss:$0 sm:$0xff] }
   0xf   : > { %s282_s14 = scalar_lea.vmem %s5494_s0, %s4808_s11  ;;  %s4818_s17 = scalar_lea.vmem %s5495_s1, %s4808_s11 }
  0x10   : > { %v4821_v5 = vld [vmem:[%s282_s14] sm:$0xff]  ;;  %s290_s9 = scalar_lea.vmem %s5501_s7, %s4808_s11 }
  0x11   : > { %v293_v6 = vld [vmem:[%s4818_s17] sm:$0xff]  ;;  %v296_v23 = vpack.c.bf16 %v4821_v5, %v4821_v5 }
  0x12   : > { %v294_v7 = vadd.f32 %v293_v6, %v4821_v5 }
  0x14   : > { %v295_v10 = vpack.c.bf16 %v294_v7, %v294_v7 }
  0x16   : > { %4226 = vmatmul.mubr.msk.bf16.vlgmr.msra.gmra.mrb[0].mxu1 %vm353_vm1, %v295_v10  ;;  %4242 = vmatmul.mubr.msk.bf16.vlgmr.msra.gmra.mrb[0].mxu0 %vm353_vm1, %v295_v10 }
  0x17   : > { %4230 = vmatpush3.bf16.msra.mxu1 %v4619_v8  ;;  %4254 = vmatpush3.bf16.msra.mxu0 %v4620_v9 }
  0x18   : > { %4231 = vmatprep.subr.bf16.mxu1 %v4738_v1  ;;  %4255 = vmatprep.subr.bf16.mxu0 %v4738_v1 }
  0x19   : > { %4233 = vmatprep.mubr.msk.bf16.mxu1 %vm4739_vm0, %v4738_v1  ;;  %4257 = vmatprep.mubr.msk.bf16.mxu0 %vm4739_vm0, %v4738_v1 }
  0x1b   : > { %4232 = vmatpush3.bf16.msra.mxu1 %v4621_v11  ;;  %4256 = vmatpush3.bf16.msra.mxu0 %v4622_v12 }
  0x1c   : > { %4245 = vmatprep.subr.bf16.mxu1 %v4738_v1  ;;  %4269 = vmatprep.subr.bf16.mxu0 %v4738_v1 }
  0x1e   : > { %4234 = vmatmul.mubr.msk.bf16.vlgmr.msra.gmra.mrb[4].mxu1 %vm353_vm1, %v295_v10  ;;  %4258 = vmatmul.mubr.msk.bf16.vlgmr.msra.gmra.mrb[4].mxu0 %vm353_vm1, %v295_v10 }
  0x1f   : > { %4246 = vmatpush3.bf16.msra.mxu1 %v4623_v13  ;;  %4270 = vmatpush3.bf16.msra.mxu0 %v4624_v14  ;;  %v3758_v13 = vld [vmem:[%s5498_s4 + $0x1] ss:$0 sm:$0xff] }
  0x20   : > { %4247 = vmatprep.subr.bf16.mxu1 %v4738_v1  ;;  %4271 = vmatprep.subr.bf16.mxu0 %v4738_v1 }
  0x21   : > { %4249 = vmatprep.mubr.msk.bf16.mxu1 %vm4739_vm0, %v4738_v1  ;;  %4273 = vmatprep.mubr.msk.bf16.mxu0 %vm4739_vm0, %v4738_v1 }
  0x23   : > { %4248 = vmatpush3.bf16.msra.mxu1 %v4625_v15  ;;  %4272 = vmatpush3.bf16.msra.mxu0 %v4626_v16  ;;  %v3796_v15 = vld [vmem:[%s5498_s4 + $0x7] ss:$0 sm:$0xff] }
  0x24   : > { %4261 = vmatprep.subr.bf16.mxu1 %v4738_v1  ;;  %4285 = vmatprep.subr.bf16.mxu0 %v4738_v1 }
  0x26   : > { %4250 = vmatmul.mubr.msk.bf16.vlgmr.msra.gmra.mrb[8].mxu1 %vm353_vm1, %v295_v10  ;;  %4274 = vmatmul.mubr.msk.bf16.vlgmr.msra.gmra.mrb[8].mxu0 %vm353_vm1, %v295_v10 }
  0x27   : > { %4262 = vmatpush3.bf16.msra.mxu1 %v4627_v17  ;;  %4265 = vmatprep.mubr.msk.bf16.mxu1 %vm4739_vm0, %v4738_v1 }
  0x28   : > { %4263 = vmatprep.subr.bf16.mxu1 %v4738_v1  ;;  %4286 = vmatpush3.bf16.msra.mxu0 %v4631_v18 }
  0x29   : > { %4287 = vmatprep.subr.bf16.mxu0 %v4738_v1  ;;  %4289 = vmatprep.mubr.msk.bf16.mxu0 %vm4739_vm0, %v4738_v1 }
  0x2b   : > { %4264 = vmatpush3.bf16.msra.mxu1 %v4628_v19 }
  0x2c   : > { %4277 = vmatprep.subr.bf16.mxu1 %v4738_v1  ;;  %4288 = vmatpush3.bf16.msra.mxu0 %v4632_v20 }
  0x2d   : > { %4301 = vmatprep.subr.bf16.mxu0 %v4738_v1 }
  0x2e   : > { %4266 = vmatmul.mubr.msk.bf16.vlgmr.msra.gmra.mrb[12].mxu1 %vm353_vm1, %v295_v10 }
  0x2f   : > { %4278 = vmatpush3.bf16.msra.mxu1 %v4629_v21  ;;  %4281 = vmatprep.mubr.msk.bf16.mxu1 %vm4739_vm0, %v4738_v1 }
  0x30   : > { %4279 = vmatprep.subr.bf16.mxu1 %v4738_v1  ;;  %4290 = vmatmul.mubr.msk.bf16.vlgmr.msra.gmra.mrb[12].mxu0 %vm353_vm1, %v296_v23 }
  0x31   : > { %4302 = vmatpush3.bf16.msra.mxu0 %v4633_v24  ;;  %4305 = vmatprep.mubr.msk.bf16.mxu0 %vm4739_vm0, %v4738_v1  ;;  %v3760_v24 = vld [vmem:[%s5498_s4 + $0x3] ss:$0 sm:$0xff] }
  0x32   : > { %4303 = vmatprep.subr.bf16.mxu0 %v4738_v1 }
  0x33   : > { %4280 = vmatpush3.bf16.msra.mxu1 %v4630_v22 }
  0x34   : > { %4293 = vmatprep.subr.bf16.mxu1 %v4738_v1 }
  0x35   : > { %4304 = vmatpush3.bf16.msra.mxu0 %v4634_v25 }
  0x36   : > { %4282 = vmatmul.mubr.msk.bf16.vlgmr.msra.gmra.mrb[16].mxu1 %vm353_vm1, %v295_v10  ;;  %4317 = vmatprep.subr.bf16.mxu0 %v4738_v1 }
  0x37   : > { %4297 = vmatprep.mubr.msk.bf16.mxu1 %vm4739_vm0, %v4738_v1  ;;  %4294 = vmatpush3.bf16.msra.mxu1 %v4635_v26 }
  0x38   : > { %4295 = vmatprep.subr.bf16.mxu1 %v4738_v1  ;;  %4306 = vmatmul.mubr.msk.bf16.vlgmr.msra.gmra.mrb[16].mxu0 %vm353_vm1, %v296_v23 }
  0x39   : > { %4319 = vmatprep.mubr.msk.bf16.mxu0 %vm4739_vm0, %v4738_v1 }
  0x3b   : > { %4296 = vmatpush3.bf16.msra.mxu1 %v4636_v27 }
  0x3c   : > { %4309 = vmatprep.subr.bf16.mxu1 %v4738_v1 }
  0x3e   : > { %4298 = vmatmul.mubr.msk.bf16.vlgmr.msra.gmra.mrb[20].mxu1 %vm353_vm1, %v296_v23 }
  0x3f   : > { %4313 = vmatprep.mubr.msk.bf16.mxu1 %vm4739_vm0, %v4738_v1  ;;  %4310 = vmatpush3.bf16.msra.mxu1 %v4637_v28  ;;  %v3829_v28 = vld [vmem:[%s5498_s4 + $0x8] ss:$0 sm:$0xff] }
  0x40   : > { %4311 = vmatprep.subr.bf16.mxu1 %v4738_v1 }
  0x43   : > { %4312 = vmatpush3.bf16.msra.mxu1 %v4638_v29 }
  0x44   : > { %4323 = vmatprep.subr.bf16.mxu1 %v4738_v1 }
  0x46   : > { %4314 = vmatmul.mubr.msk.bf16.vlgmr.msra.gmra.mrb[24].mxu1 %vm353_vm1, %v296_v23 }
  0x47   : > { %4325 = vmatprep.mubr.msk.bf16.mxu1 %vm4739_vm0, %v4738_v1 }
  0xe9   : > { %v391_v30 = vpop.f32.mrb[0].mxu1  ;;  %v495_v31 = vpop.f32.mrb[0].mxu0 }
  0xea   : > { %v4227_v32 = vpop.f32.mrb[1].mxu1  ;;  %v4243_v33 = vpop.f32.mrb[1].mxu0  ;;  %v392_v52 = vadd.f32 %v3757_v49, %v391_v30  ;;  %v496_v4 = vadd.f32 %v3759_v0, %v495_v31 }
  0xeb   : > { %v394_v34 = vpop.f32.mrb[2].mxu1  ;;  %v498_v35 = vpop.f32.mrb[2].mxu0 }
  0xec   : > { %v4228_v36 = vpop.f32.mrb[3].mxu1  ;;  %v4244_v37 = vpop.f32.mrb[3].mxu0  ;;  %v1064_v60 = vpack.c.bf16 %v392_v52, %v392_v52  ;;  %v1066_v10 = vpack.c.bf16 %v496_v4, %v496_v4 }
  0xf1   : > { %v443_v39 = vpop.f32.mrb[4].mxu1  ;;  %v645_v40 = vpop.f32.mrb[4].mxu0 }
  0xf2   : > { %v646_v41 = vadd.f32 %v3793_v38, %v645_v40  ;;  %v4235_v42 = vpop.f32.mrb[5].mxu1  ;;  %v4259_v43 = vpop.f32.mrb[5].mxu0  ;;  %v444_v16 = vadd.f32 %v3758_v13, %v443_v39  ;;  %v3830_v39 = vld [vmem:[%s5498_s4 + $0x9] ss:$0 sm:$0xff] }
  0xf3   : > { %v446_v44 = vpop.f32.mrb[6].mxu1  ;;  %v648_v45 = vpop.f32.mrb[6].mxu0 }
  0xf4   : > { %v1068_v46 = vpack.c.bf16 %v646_v41, %v646_v41  ;;  %v4236_v47 = vpop.f32.mrb[7].mxu1  ;;  %v4260_v48 = vpop.f32.mrb[7].mxu0  ;;  %v1065_v21 = vpack.c.bf16 %v444_v16, %v444_v16 }
  0xf6   : > { %v1077_v50 = vsel %vm1072_vm2, %v1068_v46, 0 }
  0xf7   : > { %4318 = vmatpush3.bf16.xpose.msra.mxu0 %v1077_v50 }
  0xf8   : > { %4329 = vmatprep.subr.bf16.mxu0 %v4738_v1 }
  0xf9   : > { %v547_v53 = vpop.f32.mrb[8].mxu1  ;;  %v749_v54 = vpop.f32.mrb[8].mxu0 }
  0xfa   : > { %v750_v55 = vadd.f32 %v3795_v51, %v749_v54  ;;  %v4251_v56 = vpop.f32.mrb[9].mxu1  ;;  %v4275_v57 = vpop.f32.mrb[9].mxu0  ;;  %v548_v26 = vadd.f32 %v3760_v24, %v547_v53 }
  0xfb   : > { %v550_v58 = vpop.f32.mrb[10].mxu1  ;;  %v752_v59 = vpop.f32.mrb[10].mxu0 }
  0xfc   : > { %v1070_v61 = vpack.c.bf16 %v750_v55, %v750_v55  ;;  %v4252_v62 = vpop.f32.mrb[11].mxu1  ;;  %v4276_v63 = vpop.f32.mrb[11].mxu0  ;;  %v1067_v27 = vpack.c.bf16 %v548_v26, %v548_v26 }
  0xfe   : > { %v1169_v2 = vsel %vm1072_vm2, %v1070_v61, 0  ;;  %4320 = vmatmul.mubr.msk.bf16.vlgmr.msra.gmra.mrb[20].mxu0 %vm1072_vm2, %v1064_v60 }
  0xff   : > { %4330 = vmatpush3.bf16.xpose.msra.mxu0 %v1169_v2  ;;  %4331 = vmatprep.mubr.msk.bf16.mxu0 %vm4739_vm0, %v4738_v1 }
 0x100   : > { %4341 = vmatprep.subr.bf16.mxu0 %v4738_v1 }
 0x101   : > { %v697_v6 = vpop.f32.mrb[12].mxu1 }
 0x102   : > { %v698_v7 = vadd.f32 %v3794_v3, %v697_v6  ;;  %v4267_v8 = vpop.f32.mrb[13].mxu1 }
 0x103   : > { %v700_v9 = vpop.f32.mrb[14].mxu1  ;;  %v902_v29 = vpop.f32.mrb[12].mxu0 }
 0x104   : > { %v1069_v11 = vpack.c.bf16 %v698_v7, %v698_v7  ;;  %v4268_v12 = vpop.f32.mrb[15].mxu1  ;;  %v903_v30 = vadd.f32 %v3829_v28, %v902_v29  ;;  %v4291_v31 = vpop.f32.mrb[13].mxu0 }
 0x105   : > { %v905_v32 = vpop.f32.mrb[14].mxu0  ;;  %v3831_v31 = vld [vmem:[%s5498_s4 + $0xa] ss:$0 sm:$0xff] }
 0x106   : > { %v1123_v14 = vsel %vm1072_vm2, %v1069_v11, 0  ;;  %4332 = vmatmul.mubr.msk.bf16.vlgmr.msra.gmra.mrb[24].mxu0 %vm1072_vm2, %v1066_v10  ;;  %v1305_v33 = vpack.c.bf16 %v903_v30, %v903_v30  ;;  %v4292_v34 = vpop.f32.mrb[15].mxu0 }
 0x107   : > { %4324 = vmatpush3.bf16.xpose.msra.mxu1 %v1123_v14  ;;  %4343 = vmatprep.mubr.msk.bf16.mxu0 %vm4739_vm0, %v4738_v1 }
 0x108   : > { %4335 = vmatprep.subr.bf16.mxu1 %v4738_v1  ;;  %v1314_v35 = vsel %vm1312_vm3, %v1305_v33, 0 }
 0x109   : > { %v801_v17 = vpop.f32.mrb[16].mxu1  ;;  %4342 = vmatpush3.bf16.msra.mxu0 %v1314_v35 }
 0x10a   : > { %v802_v18 = vadd.f32 %v3796_v15, %v801_v17  ;;  %v4283_v19 = vpop.f32.mrb[17].mxu1  ;;  %4353 = vmatprep.subr.bf16.mxu0 %v4738_v1 }
 0x10b   : > { %v804_v20 = vpop.f32.mrb[18].mxu1  ;;  %v4993_v36 = vpop.f32.mrb[16].mxu0 }
 0x10c   : > { %v1071_v22 = vpack.c.bf16 %v802_v18, %v802_v18  ;;  %v4284_v23 = vpop.f32.mrb[19].mxu1  ;;  %v4307_v37 = vpop.f32.mrb[17].mxu0  ;;  %v1007_v32 = vadd.f32 %v3831_v31, %v4993_v36  ;;  %v4639_v36 = vld [vmem:[%s5496_s2 + $0xc0] sm:$0xff]  }
 0x10d   : > { %v1009_v38 = vpop.f32.mrb[18].mxu0 }
 0x10e   : > { %v1215_v25 = vsel %vm1072_vm2, %v1071_v22, 0  ;;  %4326 = vmatmul.mubr.msk.bf16.vlgmr.msra.gmra.mrb[28].mxu1 %vm1072_vm2, %v1065_v21  ;;  %v4308_v40 = vpop.f32.mrb[19].mxu0  ;;  %v1307_v35 = vpack.c.bf16 %v1007_v32, %v1007_v32 }
 0x10f   : > { %4336 = vmatpush3.bf16.xpose.msra.mxu1 %v1215_v25  ;;  %4337 = vmatprep.mubr.msk.bf16.mxu1 %vm4739_vm0, %v4738_v1 }
 0x110   : > { %4347 = vmatprep.subr.bf16.mxu1 %v4738_v1 }
 0x111   : > { %v954_v41 = vpop.f32.mrb[20].mxu1 }
 0x112   : > { %v955_v42 = vadd.f32 %v3830_v39, %v954_v41  ;;  %v4299_v43 = vpop.f32.mrb[21].mxu1  ;;  %v1406_v39 = vsel %vm1312_vm3, %v1307_v35, 0 }
 0x113   : > { %v957_v44 = vpop.f32.mrb[22].mxu1  ;;  %v3832_v43 = vld [vmem:[%s5498_s4 + $0xb] ss:$0 sm:$0xff] }
 0x114   : > { %v1306_v45 = vpack.c.bf16 %v955_v42, %v955_v42  ;;  %v4300_v46 = vpop.f32.mrb[23].mxu1 }
 0x116   : > { %4338 = vmatmul.mubr.msk.bf16.vlgmr.msra.gmra.mrb[32].mxu1 %vm1072_vm2, %v1067_v27  ;;  %v1360_v47 = vsel %vm1312_vm3, %v1306_v45, 0  ;;  %v1529_v45 = vsel %vm1072_vm2, %v4639_v36, 0 }
 0x117   : > { %4349 = vmatprep.mubr.msk.bf16.mxu1 %vm4739_vm0, %v4738_v1  ;;  %4348 = vmatpush3.bf16.msra.mxu1 %v1360_v47 }
 0x118   : > { %4359 = vmatprep.subr.bf16.mxu1 %v4738_v1 }
 0x119   : > { %v5000_v48 = vpop.f32.mrb[24].mxu1 }
 0x11a   : > { %v4315_v49 = vpop.f32.mrb[25].mxu1  ;;  %v1059_v46 = vadd.f32 %v3832_v43, %v5000_v48 }
 0x11b   : > { %v1061_v50 = vpop.f32.mrb[26].mxu1 }
 0x11c   : > { %v4316_v51 = vpop.f32.mrb[27].mxu1  ;;  %v4640_v50 = vld [vmem:[%s5496_s2 + $0xc8] sm:$0xff]  }
 0x11d   : > { %v1308_v51 = vpack.c.bf16 %v1059_v46, %v1059_v46  ;;  %v1532_v48 = vsel %vm1072_vm2, %v4640_v50, 0 }
 0x1d1   : > { %v1113_v52 = vpop.f32.mrb[20].mxu0 }
 0x1d2   : > { %v4321_v53 = vpop.f32.mrb[21].mxu0  ;;  %v1257_v54 = vsel %vm1072_vm2, %v1113_v52, -inf }
 0x1d3   : > { %1258 = vmax.xlane.f32.xlu0 %v1257_v54  ;;  %v1116_v55 = vpop.f32.mrb[22].mxu0  ;;  %v1452_v54 = vsel %vm1312_vm3, %v1308_v51, 0 }
 0x1d4   : > { %v4322_v56 = vpop.f32.mrb[23].mxu0 }
 0x1d9   : > { %v1205_v57 = vpop.f32.mrb[24].mxu0 }
 0x1da   : > { %v4333_v58 = vpop.f32.mrb[25].mxu0  ;;  %v1263_v59 = vsel %vm1072_vm2, %v1205_v57, -inf }
 0x1db   : > { %1264 = vmax.xlane.f32.xlu1 %v1263_v59  ;;  %v1208_v60 = vpop.f32.mrb[26].mxu0  ;;  %v4641_v58 = vld [vmem:[%s5496_s2 + $0xd0] sm:$0xff]  }
 0x1dc   : > { %v4334_v61 = vpop.f32.mrb[27].mxu0  ;;  %v1588_v59 = vsel %vm1072_vm2, %v4641_v58, 0  ;;  %v4643_v60 = vld [vmem:[%s5496_s2 + $0xd8] sm:$0xff]  }
 0x1dd   : > { %v1591_v61 = vsel %vm1072_vm2, %v4643_v60, 0  ;;  %v4647_v60 = vld [vmem:[%s5497_s3] sm:$0xff]  }
 0x1e1   : > { %v1159_v62 = vpop.f32.mrb[28].mxu1 }
 0x1e2   : > { %v4327_v63 = vpop.f32.mrb[29].mxu1  ;;  %v1260_v0 = vsel %vm1072_vm2, %v1159_v62, -inf }
 0x1e3   : > { %1261 = vmax.xlane.f32.xlu0 %v1260_v0  ;;  %v1162_v2 = vpop.f32.mrb[30].mxu1 }
 0x1e4   : > { %v4328_v3 = vpop.f32.mrb[31].mxu1 }
 0x1e9   : > { %v1251_v4 = vpop.f32.mrb[32].mxu1 }
 0x1ea   : > { %v4339_v6 = vpop.f32.mrb[33].mxu1  ;;  %v1266_v7 = vsel %vm1072_vm2, %v1251_v4, -inf }
 0x1eb   : > { %1267 = vmax.xlane.f32.xlu1 %v1266_v7  ;;  %v1254_v8 = vpop.f32.mrb[34].mxu1  ;;  %v4644_v7 = vld [vmem:[%s5496_s2 + $0xe8] sm:$0xff]  }
 0x1ec   : > { %v4340_v9 = vpop.f32.mrb[35].mxu1 }
 0x260   : > { %v1259_v10 = vpop.xlane.xlu0 %1258 }
 0x261   : > { %v1269_v11 = vsub.f32 %v1113_v52, %v1259_v10  ;;  %v1650_v10 = vsel %vm1072_vm2, %v4644_v7, 0  ;;  %v3885_v7 = vld [vmem:[%s5499_s5 + $0x3] ss:$0 sm:$0xff] }
 0x263   : > { %v1273_v12 = vmul.f32 1.442695, %v1269_v11 }
 0x265   : > { %4687 = vpow2.f32 %v1273_v12 }
 0x268   : > { %v1265_v13 = vpop.xlane.xlu1 %1264 }
 0x269   : > { %v1271_v14 = vsub.f32 %v1205_v57, %v1265_v13  ;;  %v4645_v13 = vld [vmem:[%s5496_s2 + $0xf0] sm:$0xff]  }
 0x26b   : > { %v1277_v15 = vmul.f32 1.442695, %v1271_v14 }
 0x26d   : > { %4689 = vpow2.f32 %v1277_v15 }
 0x26f   : > { %v4688_v16 = vpop.eup %4687 }
 0x270   : > { %v1262_v17 = vpop.xlane.xlu0 %1261  ;;  %v1281_v18 = vsel %vm1072_vm2, %v4688_v16, 0.0 }
 0x271   : > { %v1270_v19 = vsub.f32 %v1159_v62, %v1262_v17  ;;  %1282 = vadd.xlane.f32.xlu0 %v1281_v18  ;;  %v4642_v62 = vld [vmem:[%s5496_s2 + $0xe0] sm:$0xff]   ;;  %v1706_v18 = vsel %vm1072_vm2, %v4645_v13, 0 }
 0x272   : > { %v1647_v3 = vsel %vm1072_vm2, %v4642_v62, 0  ;;  %v3886_v13 = vld [vmem:[%s5500_s6] ss:$0 sm:$0xff] }
 0x273   : > { %v1275_v20 = vmul.f32 1.442695, %v1270_v19 }
 0x275   : > { %4691 = vpow2.f32 %v1275_v20 }
 0x277   : > { %v4690_v21 = vpop.eup %4689 }
 0x278   : > { %v1268_v22 = vpop.xlane.xlu1 %1267  ;;  %v1287_v23 = vsel %vm1072_vm2, %v4690_v21, 0.0 }
 0x279   : > { %v1272_v24 = vsub.f32 %v1251_v4, %v1268_v22  ;;  %1288 = vadd.xlane.f32.xlu0 %v1287_v23 }
 0x27b   : > { %v1279_v25 = vmul.f32 1.442695, %v1272_v24 }
 0x27d   : > { %4693 = vpow2.f32 %v1279_v25 }
 0x27f   : > { %v4692_v26 = vpop.eup %4691 }
 0x280   : > { %v1284_v27 = vsel %vm1072_vm2, %v4692_v26, 0.0 }
 0x281   : > { %1285 = vadd.xlane.f32.xlu1 %v1284_v27 }
 0x287   : > { %v4694_v28 = vpop.eup %4693 }
 0x288   : > { %v1290_v29 = vsel %vm1072_vm2, %v4694_v28, 0.0 }
 0x289   : > { %1291 = vadd.xlane.f32.xlu1 %v1290_v29 }
 0x2fe   : > { %v1283_v30 = vpop.xlane.xlu0 %1282 }
 0x2ff   : > { %4695 = vrcp.f32 %v1283_v30 }
 0x306   : > { %v1289_v33 = vpop.xlane.xlu0 %1288 }
 0x307   : > { %4697 = vrcp.f32 %v1289_v33 }
 0x309   : > { %v4696_v34 = vpop.eup %4695 }
 0x30a   : > { %v1297_v37 = vmul.f32 %v4696_v34, %v4688_v16 }
 0x30c   : > { %v1301_v38 = vpack.c.bf16 %v1297_v37, %v1297_v37 }
 0x30e   : > { %4344 = vmatmul.mubr.msk.bf16.vlgmr.msra.gmra.mrb[28].mxu0 %vm1072_vm2, %v1301_v38  ;;  %v1286_v40 = vpop.xlane.xlu1 %1285 }
 0x30f   : > { %4354 = vmatpush3.bf16.msra.mxu0 %v1406_v39  ;;  %4699 = vrcp.f32 %v1286_v40  ;;  %4355 = vmatprep.mubr.msk.bf16.mxu0 %vm4739_vm0, %v4738_v1 }
 0x310   : > { %4365 = vmatprep.subr.bf16.mxu0 %v4738_v1 }
 0x311   : > { %v4698_v41 = vpop.eup %4697 }
 0x312   : > { %v1299_v42 = vmul.f32 %v4698_v41, %v4690_v21  ;;  %v4646_v21 = vld [vmem:[%s5496_s2 + $0xf8] sm:$0xff]  }
 0x313   : > { %v1709_v24 = vsel %vm1072_vm2, %v4646_v21, 0  ;;  %v3895_v21 = vld [vmem:[%s5499_s5 + $0x1] ss:$0 sm:$0xff] }
 0x314   : > { %v1303_v44 = vpack.c.bf16 %v1299_v42, %v1299_v42 }
 0x316   : > { %4356 = vmatmul.mubr.msk.bf16.vlgmr.msra.gmra.mrb[32].mxu0 %vm1072_vm2, %v1303_v44  ;;  %v1292_v47 = vpop.xlane.xlu1 %1291 }
 0x317   : > { %4701 = vrcp.f32 %v1292_v47  ;;  %4369 = vmatprep.mubr.msk.bf16.mxu0 %vm4739_vm0, %v4738_v1  ;;  %v3881_v47 = vld [vmem:[%s5499_s5] ss:$0 sm:$0xff] }
 0x318   : > { %4366 = vmatpush3.bf16.xpose.msra.mxu0 %v1529_v45 }
 0x319   : > { %v4700_v49 = vpop.eup %4699  ;;  %4367 = vmatprep.subr.bf16.mxu0 %v4738_v1 }
 0x31a   : > { %v1298_v52 = vmul.f32 %v4700_v49, %v4692_v26 }
 0x31c   : > { %v1302_v53 = vpack.c.bf16 %v1298_v52, %v1298_v52 }
 0x31e   : > { %4350 = vmatmul.mubr.msk.bf16.vlgmr.msra.gmra.mrb[36].mxu1 %vm1072_vm2, %v1302_v53 }
 0x31f   : > { %4360 = vmatpush3.bf16.msra.mxu1 %v1452_v54  ;;  %4361 = vmatprep.mubr.msk.bf16.mxu1 %vm4739_vm0, %v4738_v1 }
 0x320   : > { %4368 = vmatpush3.bf16.xpose.msra.mxu0 %v1532_v48  ;;  %4373 = vmatprep.subr.bf16.mxu1 %v4738_v1 }
 0x321   : > { %v4702_v55 = vpop.eup %4701  ;;  %4381 = vmatprep.subr.bf16.mxu0 %v4738_v1 }
 0x322   : > { %v1300_v56 = vmul.f32 %v4702_v55, %v4694_v28 }
 0x324   : > { %v1304_v57 = vpack.c.bf16 %v1300_v56, %v1300_v56 }
 0x326   : > { %4362 = vmatmul.mubr.msk.bf16.vlgmr.msra.gmra.mrb[40].mxu1 %vm1072_vm2, %v1304_v57 }
 0x327   : > { %4377 = vmatprep.mubr.msk.bf16.mxu1 %vm4739_vm0, %v4738_v1 }
 0x328   : > { %4374 = vmatpush3.bf16.xpose.msra.mxu1 %v1588_v59 }
 0x329   : > { %4375 = vmatprep.subr.bf16.mxu1 %v4738_v1 }
 0x330   : > { %4376 = vmatpush3.bf16.xpose.msra.mxu1 %v1591_v61  ;;  %v4649_v61 = vld [vmem:[%s5497_s3 + $0x10] sm:$0xff]  }
 0x331   : > { %4389 = vmatprep.subr.bf16.mxu1 %v4738_v1  ;;  %v1896_v62 = vsel %vm1891_vm4, %v4649_v61, 0  ;;  %v4667_v61 = vld [vmem:[%s5496_s2 + $0x170] sm:$0xff]  }
 0x3e1   : > { %v1350_v63 = vpop.f32.mrb[28].mxu0 }
 0x3e2   : > { %v1494_v0 = vpack.c.bf16 %v1350_v63, %v1350_v63  ;;  %v4345_v2 = vpop.f32.mrb[29].mxu0 }
 0x3e3   : > { %v1353_v4 = vpop.f32.mrb[30].mxu0 }
 0x3e4   : > { %v4346_v6 = vpop.f32.mrb[31].mxu0  ;;  %4370 = vmatmul.mubr.msk.bf16.vlgmr.msra.gmra.mrb[36].mxu0 %vm1072_vm2, %v1494_v0  ;;  %v3884_v4 = vld [vmem:[%s5499_s5 + $0x2] ss:$0 sm:$0xff] }
 0x3e5   : > { %4382 = vmatpush3.bf16.xpose.msra.mxu0 %v1647_v3  ;;  %4385 = vmatprep.mubr.msk.bf16.mxu0 %vm4739_vm0, %v4738_v1 }
 0x3e6   : > { %4383 = vmatprep.subr.bf16.mxu0 %v4738_v1 }
 0x3e9   : > { %v1442_v8 = vpop.f32.mrb[32].mxu0 }
 0x3ea   : > { %v4357_v9 = vpop.f32.mrb[33].mxu0  ;;  %v1496_v15 = vpack.c.bf16 %v1442_v8, %v1442_v8 }
 0x3eb   : > { %v1445_v11 = vpop.f32.mrb[34].mxu0 }
 0x3ec   : > { %v4358_v12 = vpop.f32.mrb[35].mxu0  ;;  %v4650_v11 = vld [vmem:[%s5497_s3 + $0x18] sm:$0xff]  }
 0x3ed   : > { %4384 = vmatpush3.bf16.xpose.msra.mxu0 %v1650_v10  ;;  %v1899_v12 = vsel %vm1891_vm4, %v4650_v11, 0 }
 0x3ee   : > { %4397 = vmatprep.subr.bf16.mxu0 %v4738_v1 }
 0x3f1   : > { %v1396_v14 = vpop.f32.mrb[36].mxu1 }
 0x3f2   : > { %v1495_v16 = vpack.c.bf16 %v1396_v14, %v1396_v14  ;;  %v4351_v17 = vpop.f32.mrb[37].mxu1 }
 0x3f3   : > { %v1399_v19 = vpop.f32.mrb[38].mxu1 }
 0x3f4   : > { %4386 = vmatmul.mubr.msk.bf16.vlgmr.msra.gmra.mrb[40].mxu0 %vm1072_vm2, %v1496_v15  ;;  %v4352_v20 = vpop.f32.mrb[39].mxu1  ;;  %4378 = vmatmul.mubr.msk.bf16.vlgmr.msra.gmra.mrb[44].mxu1 %vm1072_vm2, %v1495_v16 }
 0x3f5   : > { %4390 = vmatpush3.bf16.xpose.msra.mxu1 %v1706_v18  ;;  %4393 = vmatprep.mubr.msk.bf16.mxu1 %vm4739_vm0, %v4738_v1 }
 0x3f6   : > { %4391 = vmatprep.subr.bf16.mxu1 %v4738_v1  ;;  %4401 = vmatprep.mubr.msk.bf16.mxu0 %vm4739_vm0, %v4738_v1 }
 0x3f7   : > { %4398 = vmatpush3.bf16.msra.mxu0 %v4647_v60  ;;  %v4665_v60 = vld [vmem:[%s5496_s2 + $0x158] sm:$0xff]  }
 0x3f8   : > { %4399 = vmatprep.subr.bf16.mxu0 %v4738_v1 }
 0x3f9   : > { %v1488_v22 = vpop.f32.mrb[40].mxu1 }
 0x3fa   : > { %v4363_v23 = vpop.f32.mrb[41].mxu1  ;;  %v1497_v27 = vpack.c.bf16 %v1488_v22, %v1488_v22 }
 0x3fb   : > { %v1491_v25 = vpop.f32.mrb[42].mxu1 }
 0x3fc   : > { %v4364_v26 = vpop.f32.mrb[43].mxu1 }
 0x3fd   : > { %4392 = vmatpush3.bf16.xpose.msra.mxu1 %v1709_v24 }
 0x3fe   : > { %4405 = vmatprep.subr.bf16.mxu1 %v4738_v1 }
 0x404   : > { %4394 = vmatmul.mubr.msk.bf16.vlgmr.msra.gmra.mrb[48].mxu1 %vm1072_vm2, %v1497_v27 }
 0x405   : > { %4409 = vmatprep.mubr.msk.bf16.mxu1 %vm4739_vm0, %v4738_v1  ;;  %4406 = vmatpush3.bf16.xpose.msra.mxu1 %v1896_v62  ;;  %v4668_v62 = vld [vmem:[%s5496_s2 + $0x1a0] sm:$0xff]  }
 0x406   : > { %4407 = vmatprep.subr.bf16.mxu1 %v4738_v1 }
 0x40d   : > { %4408 = vmatpush3.bf16.xpose.msra.mxu1 %v1899_v12 }
 0x40e   : > { %4429 = vmatprep.subr.bf16.mxu1 %v4738_v1 }
 0x4b7   : > { %v1568_v28 = vpop.f32.mrb[36].mxu0 }
 0x4b8   : > { %v4371_v29 = vpop.f32.mrb[37].mxu0  ;;  %v1751_v34 = vsel %vm353_vm1, %v1568_v28, 0.0 }
 0x4b9   : > { %v1571_v30 = vpop.f32.mrb[38].mxu0 }
 0x4ba   : > { %v4372_v31 = vpop.f32.mrb[39].mxu0 }
 0x4c7   : > { %v1686_v32 = vpop.f32.mrb[40].mxu0  ;;  %v1627_v33 = vpop.f32.mrb[44].mxu1 }
 0x4c8   : > { %v1752_v35 = vsel %vm353_vm1, %v1627_v33, 0.0  ;;  %v4387_v37 = vpop.f32.mrb[41].mxu0  ;;  %v4379_v38 = vpop.f32.mrb[45].mxu1  ;;  %v1754_v36 = vsel %vm353_vm1, %v1686_v32, 0.0 }
 0x4c9   : > { %v1753_v39 = vadd.f32 %v1752_v35, %v1751_v34  ;;  %v1689_v40 = vpop.f32.mrb[42].mxu0  ;;  %v1630_v41 = vpop.f32.mrb[46].mxu1  ;;  %v4651_v34 = vld [vmem:[%s5496_s2 + $0x100] sm:$0xff]   ;;  %v4653_v37 = vld [vmem:[%s5496_s2 + $0x108] sm:$0xff]  }
 0x4ca   : > { %v4388_v42 = vpop.f32.mrb[43].mxu0  ;;  %v4380_v43 = vpop.f32.mrb[47].mxu1  ;;  %v4652_v35 = vld [vmem:[%s5496_s2 + $0x120] sm:$0xff]   ;;  %v4654_v38 = vld [vmem:[%s5496_s2 + $0x128] sm:$0xff]  }
 0x4cb   : > { %v1755_v44 = vadd.f32 %v1754_v36, %v1753_v39  ;;  %v3901_v42 = vld [vmem:[%s5499_s5 + $0x4] ss:$0 sm:$0xff] }
 0x4d7   : > { %v1745_v45 = vpop.f32.mrb[48].mxu1 }
 0x4d8   : > { %v1756_v46 = vsel %vm353_vm1, %v1745_v45, 0.0  ;;  %v4395_v49 = vpop.f32.mrb[49].mxu1 }
 0x4d9   : > { %v1757_v50 = vadd.f32 %v1756_v46, %v1755_v44  ;;  %v1748_v51 = vpop.f32.mrb[50].mxu1  ;;  %v3902_v44 = vld [vmem:[%s5499_s5 + $0x5] ss:$0 sm:$0xff] }
 0x4da   : > { %v4396_v52 = vpop.f32.mrb[51].mxu1  ;;  %v4656_v51 = vld [vmem:[%s5496_s2 + $0x140] sm:$0xff]  }
 0x4db   : > { %v1765_v53 = vadd.f32 %v3881_v47, %v1757_v50  ;;  %v4729_v47 = vld [vmem:[%s4818_s17] sm:$0xff]  ;;  %v4655_v50 = vld [vmem:[%s5496_s2 + $0x110] sm:$0xff]  }
 0x4dd   : > { %v1766_v48 = vadd.f32 %v1765_v53, %v4821_v5  ;;  %v4648_v5 = vld [vmem:[%s5497_s3 + $0x8] sm:$0xff]   ;;  %v4657_v53 = vld [vmem:[%s5496_s2 + $0x118] sm:$0xff]  }
 0x4de   : > { %4400 = vmatpush3.bf16.msra.mxu0 %v4648_v5  ;;  %v4666_v5 = vld [vmem:[%s5496_s2 + $0x188] sm:$0xff]  }
 0x4df   : > { %v1771_v54 = vsel %vm353_vm1, %v1766_v48, 0.0  ;;  %4413 = vmatprep.subr.bf16.mxu0 %v4738_v1 }
 0x4e0   : > { %1772 = vadd.xlane.f32.xlu0 %v1771_v54  ;;  %v4659_v54 = vld [vmem:[%s5496_s2 + $0x130] sm:$0xff]  }
 0x56d   : > { %v1773_v55 = vpop.xlane.xlu0 %1772 }
 0x56e   : > { %v1775_v56 = vmul.f32 0.03125, %v1773_v55  ;;  %v4660_v55 = vld [vmem:[%s5496_s2 + $0x160] sm:$0xff]  }
 0x570   : > { %v1776_v57 = vsub.f32 %v1766_v48, %v1775_v56  ;;  %v4658_v48 = vld [vmem:[%s5496_s2 + $0x148] sm:$0xff]   ;;  %v4661_v56 = vld [vmem:[%s5496_s2 + $0x138] sm:$0xff]  }
 0x572   : > { %v1777_v58 = vmul.f32 %v1776_v57, %v1776_v57 }
 0x574   : > { %v1778_v59 = vsel %vm353_vm1, %v1777_v58, 0.0  ;;  %v4663_v58 = vld [vmem:[%s5496_s2 + $0x150] sm:$0xff]  }
 0x575   : > { %1779 = vadd.xlane.f32.xlu1 %v1778_v59  ;;  %v4664_v59 = vld [vmem:[%s5496_s2 + $0x180] sm:$0xff]  }
 0x602   : > { %v1780_v63 = vpop.xlane.xlu1 %1779 }
 0x603   : > { %v1781_v0 = vmul.f32 0.03125, %v1780_v63 }
 0x605   : > { %v1782_v2 = vadd.f32 1e-05, %v1781_v0  ;;  %v4669_v0 = vld [vmem:[%s5496_s2 + $0x178] sm:$0xff]  }
 0x607   : > { %4703 = vrsqrt.f32 %v1782_v2  ;;  %v4670_v2 = vld [vmem:[%s5496_s2 + $0x1a8] sm:$0xff]  }
 0x611   : > { %v4704_v3 = vpop.eup %4703 }
 0x612   : > { %v1784_v6 = vmul.f32 %v4704_v3, %v1776_v57  ;;  %v4662_v57 = vld [vmem:[%s5496_s2 + $0x168] sm:$0xff]   ;;  %v4671_v3 = vld [vmem:[%s5496_s2 + $0x190] sm:$0xff]  }
 0x614   : > { %v1791_v8 = vmul.f32 %v3884_v4, %v1784_v6  ;;  %v4672_v4 = vld [vmem:[%s5496_s2 + $0x198] sm:$0xff]   ;;  %v4673_v6 = vld [vmem:[%s5496_s2 + $0x1b0] sm:$0xff]  }
 0x616   : > { %v1798_v9 = vadd.f32 %v3885_v7, %v1791_v8  ;;  %v4674_v7 = vld [vmem:[%s5496_s2 + $0x1b8] sm:$0xff]  }
 0x618   : > { %v1799_v10 = vpack.c.bf16 %v1798_v9, %v1798_v9 }
 0x61a   : > { %4402 = vmatmul.mubr.msk.bf16.vlgmr.msra.gmra.mrb[44].mxu0 %vm353_vm1, %v1799_v10 }
 0x61b   : > { %4417 = vmatprep.mubr.msk.bf16.mxu0 %vm4739_vm0, %v4738_v1  ;;  %4414 = vmatpush3.bf16.msra.mxu0 %v4651_v34 }
 0x61c   : > { %4415 = vmatprep.subr.bf16.mxu0 %v4738_v1 }
 0x61f   : > { %4416 = vmatpush3.bf16.msra.mxu0 %v4653_v37 }
 0x620   : > { %4421 = vmatprep.subr.bf16.mxu0 %v4738_v1 }
 0x6ed   : > { %v1860_v14 = vpop.f32.mrb[44].mxu0 }
 0x6ee   : > { %v1861_v15 = vadd.f32 %v3886_v13, %v1860_v14  ;;  %v4403_v16 = vpop.f32.mrb[45].mxu0 }
 0x6ef   : > { %v1863_v17 = vpop.f32.mrb[46].mxu0  ;;  %v3959_v16 = vld [vmem:[%s5498_s4 + $0x10] ss:$0 sm:$0xff] }
 0x6f0   : > { %v1866_v18 = vmax.f32 %v1861_v15, 0.0  ;;  %v4404_v19 = vpop.f32.mrb[47].mxu0 }
 0x6f2   : > { %v1867_v20 = vpack.c.bf16 %v1866_v18, %v1866_v18 }
 0x6f4   : > { %4410 = vmatmul.mubr.msk.bf16.vlgmr.msra.gmra.mrb[52].mxu1 %vm1891_vm4, %v1867_v20 }
 0x6f5   : > { %4433 = vmatprep.mubr.msk.bf16.mxu1 %vm4739_vm0, %v4738_v1  ;;  %4430 = vmatpush3.bf16.msra.mxu1 %v4652_v35 }
 0x6f6   : > { %4431 = vmatprep.subr.bf16.mxu1 %v4738_v1 }
 0x6f9   : > { %4432 = vmatpush3.bf16.msra.mxu1 %v4654_v38 }
 0x6fa   : > { %4445 = vmatprep.subr.bf16.mxu1 %v4738_v1 }
 0x7c7   : > { %v1935_v22 = vpop.f32.mrb[52].mxu1 }
 0x7c8   : > { %v1936_v23 = vadd.f32 %v3895_v21, %v1935_v22  ;;  %v4411_v24 = vpop.f32.mrb[53].mxu1 }
 0x7c9   : > { %v1938_v25 = vpop.f32.mrb[54].mxu1 }
 0x7ca   : > { %v4412_v26 = vpop.f32.mrb[55].mxu1  ;;  %v1941_v27 = vadd.f32 %v1936_v23, %v1798_v9 }
 0x7cc   : > { %v1946_v28 = vsel %vm353_vm1, %v1941_v27, 0.0 }
 0x7cd   : > { %1947 = vadd.xlane.f32.xlu0 %v1946_v28 }
 0x85a   : > { %v1948_v29 = vpop.xlane.xlu0 %1947 }
 0x85b   : > { %v1949_v30 = vmul.f32 0.03125, %v1948_v29  ;;  %v3961_v29 = vld [vmem:[%s5498_s4 + $0x12] ss:$0 sm:$0xff] }
 0x85d   : > { %v1950_v31 = vsub.f32 %v1941_v27, %v1949_v30  ;;  %v3923_v27 = vld [vmem:[%s5498_s4 + $0xc] ss:$0 sm:$0xff] }
 0x85f   : > { %v1951_v32 = vmul.f32 %v1950_v31, %v1950_v31 }
 0x861   : > { %v1952_v33 = vsel %vm353_vm1, %v1951_v32, 0.0 }
 0x862   : > { %1953 = vadd.xlane.f32.xlu1 %v1952_v33 }
 0x8ef   : > { %v1954_v39 = vpop.xlane.xlu1 %1953 }
 0x8f0   : > { %v1955_v40 = vmul.f32 0.03125, %v1954_v39 }
 0x8f2   : > { %v1956_v41 = vadd.f32 1e-05, %v1955_v40 }
 0x8f4   : > { %4705 = vrsqrt.f32 %v1956_v41 }
 0x8fe   : > { %v4706_v36 = vpop.eup %4705 }
 0x8ff   : > { %v1958_v43 = vmul.f32 %v4706_v36, %v1950_v31 }
 0x901   : > { %v1965_v45 = vmul.f32 %v3901_v42, %v1958_v43  ;;  %v3925_v42 = vld [vmem:[%s5498_s4 + $0xe] ss:$0 sm:$0xff] }
 0x903   : > { %v5156_v46 = vadd.f32 %v3902_v44, %v1965_v45  ;;  %v3960_v44 = vld [vmem:[%s5498_s4 + $0x11] ss:$0 sm:$0xff]  ;;  %v3995_v45 = vld [vmem:[%s5498_s4 + $0x14] ss:$0 sm:$0xff] }
 0x905   : > { %v1973_v49 = vadd.f32 %v4729_v47, %v5156_v46  ;;  %v1975_v63 = vpack.c.bf16 %v5156_v46, %v5156_v46 }
 0x907   : > { %v5166_v52 = vpack.c.bf16 %v1973_v49, %v1973_v49 }
 0x909   : > { %4418 = vmatmul.mubr.msk.bf16.vlgmr.msra.gmra.mrb[48].mxu0 %vm353_vm1, %v5166_v52  ;;  %4434 = vmatmul.mubr.msk.bf16.vlgmr.msra.gmra.mrb[56].mxu1 %vm353_vm1, %v5166_v52 }
 0x90a   : > { %4422 = vmatpush3.bf16.msra.mxu0 %v4655_v50  ;;  %4446 = vmatpush3.bf16.msra.mxu1 %v4656_v51 }
 0x90b   : > { %4423 = vmatprep.subr.bf16.mxu0 %v4738_v1  ;;  %4447 = vmatprep.subr.bf16.mxu1 %v4738_v1 }
 0x90c   : > { %4425 = vmatprep.mubr.msk.bf16.mxu0 %vm4739_vm0, %v4738_v1  ;;  %4449 = vmatprep.mubr.msk.bf16.mxu1 %vm4739_vm0, %v4738_v1 }
 0x90e   : > { %4424 = vmatpush3.bf16.msra.mxu0 %v4657_v53  ;;  %4448 = vmatpush3.bf16.msra.mxu1 %v4658_v48 }
 0x90f   : > { %4437 = vmatprep.subr.bf16.mxu0 %v4738_v1  ;;  %4461 = vmatprep.subr.bf16.mxu1 %v4738_v1 }
 0x911   : > { %4426 = vmatmul.mubr.msk.bf16.vlgmr.msra.gmra.mrb[52].mxu0 %vm353_vm1, %v5166_v52  ;;  %4450 = vmatmul.mubr.msk.bf16.vlgmr.msra.gmra.mrb[60].mxu1 %vm353_vm1, %v5166_v52 }
 0x912   : > { %4438 = vmatpush3.bf16.msra.mxu0 %v4659_v54  ;;  %4462 = vmatpush3.bf16.msra.mxu1 %v4660_v55 }
 0x913   : > { %4439 = vmatprep.subr.bf16.mxu0 %v4738_v1  ;;  %4463 = vmatprep.subr.bf16.mxu1 %v4738_v1 }
 0x914   : > { %4441 = vmatprep.mubr.msk.bf16.mxu0 %vm4739_vm0, %v4738_v1  ;;  %4465 = vmatprep.mubr.msk.bf16.mxu1 %vm4739_vm0, %v4738_v1 }
 0x916   : > { %4440 = vmatpush3.bf16.msra.mxu0 %v4661_v56  ;;  %4464 = vmatpush3.bf16.msra.mxu1 %v4662_v57 }
 0x917   : > { %4453 = vmatprep.subr.bf16.mxu0 %v4738_v1  ;;  %4477 = vmatprep.subr.bf16.mxu1 %v4738_v1 }
 0x919   : > { %4442 = vmatmul.mubr.msk.bf16.vlgmr.msra.gmra.mrb[56].mxu0 %vm353_vm1, %v5166_v52  ;;  %4466 = vmatmul.mubr.msk.bf16.vlgmr.msra.gmra.mrb[64].mxu1 %vm353_vm1, %v5166_v52 }
 0x91a   : > { %4454 = vmatpush3.bf16.msra.mxu0 %v4663_v58  ;;  %4478 = vmatpush3.bf16.msra.mxu1 %v4664_v59 }
 0x91b   : > { %4455 = vmatprep.subr.bf16.mxu0 %v4738_v1  ;;  %4479 = vmatprep.subr.bf16.mxu1 %v4738_v1 }
 0x91c   : > { %4457 = vmatprep.mubr.msk.bf16.mxu0 %vm4739_vm0, %v4738_v1  ;;  %4481 = vmatprep.mubr.msk.bf16.mxu1 %vm4739_vm0, %v4738_v1 }
 0x91e   : > { %4456 = vmatpush3.bf16.msra.mxu0 %v4665_v60  ;;  %4480 = vmatpush3.bf16.msra.mxu1 %v4666_v5  ;;  %v3924_v5 = vld [vmem:[%s5498_s4 + $0xd] ss:$0 sm:$0xff] }
 0x91f   : > { %4469 = vmatprep.subr.bf16.mxu0 %v4738_v1  ;;  %4493 = vmatprep.subr.bf16.mxu1 %v4738_v1 }
 0x921   : > { %4458 = vmatmul.mubr.msk.bf16.vlgmr.msra.gmra.mrb[60].mxu0 %vm353_vm1, %v5166_v52  ;;  %4482 = vmatmul.mubr.msk.bf16.vlgmr.msra.gmra.mrb[68].mxu1 %vm353_vm1, %v1975_v63 }
 0x922   : > { %4470 = vmatpush3.bf16.msra.mxu0 %v4667_v61  ;;  %4494 = vmatpush3.bf16.msra.mxu1 %v4668_v62 }
 0x923   : > { %4471 = vmatprep.subr.bf16.mxu0 %v4738_v1  ;;  %4495 = vmatprep.subr.bf16.mxu1 %v4738_v1 }
 0x924   : > { %4473 = vmatprep.mubr.msk.bf16.mxu0 %vm4739_vm0, %v4738_v1  ;;  %4497 = vmatprep.mubr.msk.bf16.mxu1 %vm4739_vm0, %v4738_v1 }
 0x926   : > { %4472 = vmatpush3.bf16.msra.mxu0 %v4669_v0  ;;  %4496 = vmatpush3.bf16.msra.mxu1 %v4670_v2 }
 0x927   : > { %4485 = vmatprep.subr.bf16.mxu0 %v4738_v1  ;;  %4509 = vmatprep.subr.bf16.mxu1 %v4738_v1 }
 0x929   : > { %4474 = vmatmul.mubr.msk.bf16.vlgmr.msra.gmra.mrb[64].mxu0 %vm353_vm1, %v5166_v52  ;;  %4498 = vmatmul.mubr.msk.bf16.vlgmr.msra.gmra.mrb[72].mxu1 %vm353_vm1, %v1975_v63 }
 0x92a   : > { %4486 = vmatpush3.bf16.msra.mxu0 %v4671_v3  ;;  %4489 = vmatprep.mubr.msk.bf16.mxu0 %vm4739_vm0, %v4738_v1 }
 0x92b   : > { %4487 = vmatprep.subr.bf16.mxu0 %v4738_v1  ;;  %4511 = vmatprep.mubr.msk.bf16.mxu1 %vm4739_vm0, %v4738_v1 }
 0x92e   : > { %4488 = vmatpush3.bf16.msra.mxu0 %v4672_v4 }
 0x92f   : > { %4501 = vmatprep.subr.bf16.mxu0 %v4738_v1 }
 0x931   : > { %4490 = vmatmul.mubr.msk.bf16.vlgmr.msra.gmra.mrb[68].mxu0 %vm353_vm1, %v1975_v63 }
 0x932   : > { %4502 = vmatpush3.bf16.msra.mxu0 %v4673_v6  ;;  %4505 = vmatprep.mubr.msk.bf16.mxu0 %vm4739_vm0, %v4738_v1 }
 0x933   : > { %4503 = vmatprep.subr.bf16.mxu0 %v4738_v1 }
 0x936   : > { %4504 = vmatpush3.bf16.msra.mxu0 %v4674_v7 }
 0x937   : > { %4515 = vmatprep.subr.bf16.mxu0 %v4738_v1 }
 0x939   : > { %4506 = vmatmul.mubr.msk.bf16.vlgmr.msra.gmra.mrb[72].mxu0 %vm353_vm1, %v1975_v63  ;;  %v3962_v63 = vld [vmem:[%s5498_s4 + $0x13] ss:$0 sm:$0xff] }
 0x93a   : > { %4517 = vmatprep.mubr.msk.bf16.mxu0 %vm4739_vm0, %v4738_v1 }
 0x9dc   : > { %v2071_v8 = vpop.f32.mrb[48].mxu0  ;;  %v2175_v9 = vpop.f32.mrb[56].mxu1 }
 0x9dd   : > { %v4419_v10 = vpop.f32.mrb[49].mxu0  ;;  %v4435_v11 = vpop.f32.mrb[57].mxu1  ;;  %v2072_v30 = vadd.f32 %v3923_v27, %v2071_v8  ;;  %v2176_v47 = vadd.f32 %v3925_v42, %v2175_v9 }
 0x9de   : > { %v2074_v12 = vpop.f32.mrb[50].mxu0  ;;  %v2178_v13 = vpop.f32.mrb[58].mxu1 }
 0x9df   : > { %v4420_v14 = vpop.f32.mrb[51].mxu0  ;;  %v4436_v15 = vpop.f32.mrb[59].mxu1  ;;  %v2744_v39 = vpack.c.bf16 %v2072_v30, %v2072_v30  ;;  %v2746_v56 = vpack.c.bf16 %v2176_v47, %v2176_v47 }
 0x9e0   : > { %v3926_v14 = vld [vmem:[%s5498_s4 + $0xf] ss:$0 sm:$0xff] }
 0x9e4   : > { %v2123_v17 = vpop.f32.mrb[52].mxu0  ;;  %v2325_v18 = vpop.f32.mrb[60].mxu1 }
 0x9e5   : > { %v2326_v19 = vadd.f32 %v3959_v16, %v2325_v18  ;;  %v4427_v20 = vpop.f32.mrb[53].mxu0  ;;  %v4451_v21 = vpop.f32.mrb[61].mxu1  ;;  %v2124_v0 = vadd.f32 %v3924_v5, %v2123_v17  ;;  %v3996_v16 = vld [vmem:[%s5498_s4 + $0x15] ss:$0 sm:$0xff] }
 0x9e6   : > { %v2126_v22 = vpop.f32.mrb[54].mxu0  ;;  %v2328_v23 = vpop.f32.mrb[62].mxu1 }
 0x9e7   : > { %v2748_v24 = vpack.c.bf16 %v2326_v19, %v2326_v19  ;;  %v4428_v25 = vpop.f32.mrb[55].mxu0  ;;  %v4452_v26 = vpop.f32.mrb[63].mxu1  ;;  %v2745_v10 = vpack.c.bf16 %v2124_v0, %v2124_v0 }
 0x9e9   : > { %v2756_v28 = vsel %vm1072_vm2, %v2748_v24, 0 }
 0x9ea   : > { %4510 = vmatpush3.bf16.xpose.msra.mxu1 %v2756_v28 }
 0x9eb   : > { %4521 = vmatprep.subr.bf16.mxu1 %v4738_v1 }
 0x9ec   : > { %v2227_v31 = vpop.f32.mrb[56].mxu0  ;;  %v2429_v32 = vpop.f32.mrb[64].mxu1 }
 0x9ed   : > { %v2430_v33 = vadd.f32 %v3961_v29, %v2429_v32  ;;  %v4443_v34 = vpop.f32.mrb[57].mxu0  ;;  %v4467_v35 = vpop.f32.mrb[65].mxu1  ;;  %v2228_v17 = vadd.f32 %v3926_v14, %v2227_v31 }
 0x9ee   : > { %v2230_v37 = vpop.f32.mrb[58].mxu0  ;;  %v2432_v38 = vpop.f32.mrb[66].mxu1 }
 0x9ef   : > { %v2750_v40 = vpack.c.bf16 %v2430_v33, %v2430_v33  ;;  %v4444_v41 = vpop.f32.mrb[59].mxu0  ;;  %v4468_v36 = vpop.f32.mrb[67].mxu1  ;;  %v2747_v22 = vpack.c.bf16 %v2228_v17, %v2228_v17 }
 0x9f1   : > { %v2848_v43 = vsel %vm1072_vm2, %v2750_v40, 0  ;;  %4512 = vmatmul.mubr.msk.bf16.vlgmr.msra.gmra.mrb[76].mxu1 %vm1072_vm2, %v2744_v39 }
 0x9f2   : > { %4522 = vmatpush3.bf16.xpose.msra.mxu1 %v2848_v43  ;;  %4523 = vmatprep.mubr.msk.bf16.mxu1 %vm4739_vm0, %v4738_v1 }
 0x9f3   : > { %4533 = vmatprep.subr.bf16.mxu1 %v4738_v1 }
 0x9f4   : > { %v2377_v49 = vpop.f32.mrb[60].mxu0  ;;  %v2582_v50 = vpop.f32.mrb[68].mxu1 }
 0x9f5   : > { %v2378_v51 = vadd.f32 %v3960_v44, %v2377_v49  ;;  %v2583_v52 = vadd.f32 %v3995_v45, %v2582_v50  ;;  %v4459_v53 = vpop.f32.mrb[61].mxu0  ;;  %v4483_v48 = vpop.f32.mrb[69].mxu1 }
 0x9f6   : > { %v2380_v54 = vpop.f32.mrb[62].mxu0  ;;  %v2585_v55 = vpop.f32.mrb[70].mxu1 }
 0x9f7   : > { %v2749_v57 = vpack.c.bf16 %v2378_v51, %v2378_v51  ;;  %v2984_v58 = vpack.c.bf16 %v2583_v52, %v2583_v52  ;;  %v4460_v59 = vpop.f32.mrb[63].mxu0  ;;  %v4484_v60 = vpop.f32.mrb[71].mxu1 }
 0x9f9   : > { %v2802_v61 = vsel %vm1072_vm2, %v2749_v57, 0  ;;  %v2992_v62 = vsel %vm1312_vm3, %v2984_v58, 0  ;;  %4524 = vmatmul.mubr.msk.bf16.vlgmr.msra.gmra.mrb[80].mxu1 %vm1072_vm2, %v2746_v56 }
 0x9fa   : > { %4516 = vmatpush3.bf16.xpose.msra.mxu0 %v2802_v61  ;;  %4534 = vmatpush3.bf16.msra.mxu1 %v2992_v62 }
 0x9fb   : > { %4527 = vmatprep.subr.bf16.mxu0 %v4738_v1  ;;  %4535 = vmatprep.mubr.msk.bf16.mxu1 %vm4739_vm0, %v4738_v1 }
 0x9fc   : > { %v2481_v2 = vpop.f32.mrb[64].mxu0  ;;  %v5325_v3 = vpop.f32.mrb[72].mxu1  ;;  %4545 = vmatprep.subr.bf16.mxu1 %v4738_v1 }
 0x9fd   : > { %v2482_v4 = vadd.f32 %v3962_v63, %v2481_v2  ;;  %v4475_v6 = vpop.f32.mrb[65].mxu0  ;;  %v4499_v7 = vpop.f32.mrb[73].mxu1 }
 0x9fe   : > { %v2484_v8 = vpop.f32.mrb[66].mxu0  ;;  %v2689_v9 = vpop.f32.mrb[74].mxu1 }
 0x9ff   : > { %v2751_v11 = vpack.c.bf16 %v2482_v4, %v2482_v4  ;;  %v4476_v12 = vpop.f32.mrb[67].mxu0  ;;  %v4500_v13 = vpop.f32.mrb[75].mxu1 }
 0xa01   : > { %v2894_v15 = vsel %vm1072_vm2, %v2751_v11, 0  ;;  %4518 = vmatmul.mubr.msk.bf16.vlgmr.msra.gmra.mrb[76].mxu0 %vm1072_vm2, %v2745_v10  ;;  %v3997_v10 = vld [vmem:[%s5498_s4 + $0x16] ss:$0 sm:$0xff] }
 0xa02   : > { %4528 = vmatpush3.bf16.xpose.msra.mxu0 %v2894_v15  ;;  %4529 = vmatprep.mubr.msk.bf16.mxu0 %vm4739_vm0, %v4738_v1  ;;  %v2687_v11 = vadd.f32 %v3997_v10, %v5325_v3  ;;  %v4675_v3 = vld [vmem:[%s5496_s2 + $0x1c0] sm:$0xff]  }
 0xa03   : > { %4539 = vmatprep.subr.bf16.mxu0 %v4738_v1 }
 0xa04   : > { %v2634_v18 = vpop.f32.mrb[68].mxu0  ;;  %v2986_v14 = vpack.c.bf16 %v2687_v11, %v2687_v11 }
 0xa05   : > { %v2635_v19 = vadd.f32 %v3996_v16, %v2634_v18  ;;  %v4491_v20 = vpop.f32.mrb[69].mxu0 }
 0xa06   : > { %v2637_v21 = vpop.f32.mrb[70].mxu0  ;;  %v3084_v17 = vsel %vm1312_vm3, %v2986_v14, 0 }
 0xa07   : > { %v2985_v23 = vpack.c.bf16 %v2635_v19, %v2635_v19  ;;  %v4492_v24 = vpop.f32.mrb[71].mxu0  ;;  %v3998_v21 = vld [vmem:[%s5498_s4 + $0x17] ss:$0 sm:$0xff] }
 0xa09   : > { %v3038_v25 = vsel %vm1312_vm3, %v2985_v23, 0  ;;  %4530 = vmatmul.mubr.msk.bf16.vlgmr.msra.gmra.mrb[80].mxu0 %vm1072_vm2, %v2747_v22  ;;  %v3207_v23 = vsel %vm1072_vm2, %v4675_v3, 0 }
 0xa0a   : > { %4540 = vmatpush3.bf16.msra.mxu0 %v3038_v25  ;;  %4541 = vmatprep.mubr.msk.bf16.mxu0 %vm4739_vm0, %v4738_v1 }
 0xa0b   : > { %4551 = vmatprep.subr.bf16.mxu0 %v4738_v1 }
 0xa0c   : > { %v5344_v26 = vpop.f32.mrb[72].mxu0 }
 0xa0d   : > { %v4507_v27 = vpop.f32.mrb[73].mxu0  ;;  %v2739_v24 = vadd.f32 %v3998_v21, %v5344_v26 }
 0xa0e   : > { %v2741_v28 = vpop.f32.mrb[74].mxu0 }
 0xa0f   : > { %v4508_v29 = vpop.f32.mrb[75].mxu0  ;;  %v4676_v28 = vld [vmem:[%s5496_s2 + $0x1c8] sm:$0xff]  }
 0xa10   : > { %v2987_v29 = vpack.c.bf16 %v2739_v24, %v2739_v24  ;;  %v3210_v26 = vsel %vm1072_vm2, %v4676_v28, 0 }
 0xac4   : > { %v2792_v30 = vpop.f32.mrb[76].mxu1 }
 0xac5   : > { %v4513_v31 = vpop.f32.mrb[77].mxu1  ;;  %v2936_v32 = vsel %vm1072_vm2, %v2792_v30, -inf }
 0xac6   : > { %2937 = vmax.xlane.f32.xlu0 %v2936_v32  ;;  %v2795_v33 = vpop.f32.mrb[78].mxu1  ;;  %v3130_v32 = vsel %vm1312_vm3, %v2987_v29, 0 }
 0xac7   : > { %v4514_v34 = vpop.f32.mrb[79].mxu1 }
 0xacc   : > { %v2884_v35 = vpop.f32.mrb[80].mxu1 }
 0xacd   : > { %v4525_v37 = vpop.f32.mrb[81].mxu1  ;;  %v2942_v38 = vsel %vm1072_vm2, %v2884_v35, -inf }
 0xace   : > { %2943 = vmax.xlane.f32.xlu0 %v2942_v38  ;;  %v2887_v39 = vpop.f32.mrb[82].mxu1  ;;  %v4677_v37 = vld [vmem:[%s5496_s2 + $0x1d0] sm:$0xff]  }
 0xacf   : > { %v4526_v40 = vpop.f32.mrb[83].mxu1  ;;  %v3266_v38 = vsel %vm1072_vm2, %v4677_v37, 0  ;;  %v4679_v39 = vld [vmem:[%s5496_s2 + $0x1d8] sm:$0xff]  }
 0xad0   : > { %v3269_v40 = vsel %vm1072_vm2, %v4679_v39, 0  ;;  %v4683_v39 = vld [vmem:[%s5497_s3 + $0x20] sm:$0xff]  }
 0xad4   : > { %v2838_v41 = vpop.f32.mrb[76].mxu0 }
 0xad5   : > { %v4519_v36 = vpop.f32.mrb[77].mxu0  ;;  %v2939_v42 = vsel %vm1072_vm2, %v2838_v41, -inf }
 0xad6   : > { %2940 = vmax.xlane.f32.xlu1 %v2939_v42  ;;  %v2841_v43 = vpop.f32.mrb[78].mxu0 }
 0xad7   : > { %v4520_v44 = vpop.f32.mrb[79].mxu0 }
 0xadc   : > { %v2930_v45 = vpop.f32.mrb[80].mxu0 }
 0xadd   : > { %v4531_v47 = vpop.f32.mrb[81].mxu0  ;;  %v2945_v49 = vsel %vm1072_vm2, %v2930_v45, -inf }
 0xade   : > { %2946 = vmax.xlane.f32.xlu1 %v2945_v49  ;;  %v2933_v50 = vpop.f32.mrb[82].mxu0  ;;  %v4680_v49 = vld [vmem:[%s5496_s2 + $0x1e8] sm:$0xff]  }
 0xadf   : > { %v4532_v51 = vpop.f32.mrb[83].mxu0 }
 0xb53   : > { %v2938_v52 = vpop.xlane.xlu0 %2937 }
 0xb54   : > { %v2948_v53 = vsub.f32 %v2792_v30, %v2938_v52  ;;  %v3328_v52 = vsel %vm1072_vm2, %v4680_v49, 0  ;;  %v4052_v49 = vld [vmem:[%s5499_s5 + $0x9] ss:$0 sm:$0xff] }
 0xb56   : > { %v2952_v48 = vmul.f32 1.442695, %v2948_v53 }
 0xb58   : > { %4707 = vpow2.f32 %v2952_v48 }
 0xb5b   : > { %v2944_v54 = vpop.xlane.xlu0 %2943 }
 0xb5c   : > { %v2950_v55 = vsub.f32 %v2884_v35, %v2944_v54  ;;  %v4681_v54 = vld [vmem:[%s5496_s2 + $0x1f0] sm:$0xff]  }
 0xb5e   : > { %v2956_v56 = vmul.f32 1.442695, %v2950_v55 }
 0xb60   : > { %4709 = vpow2.f32 %v2956_v56 }
 0xb62   : > { %v4708_v57 = vpop.eup %4707 }
 0xb63   : > { %v2941_v58 = vpop.xlane.xlu1 %2940  ;;  %v2960_v59 = vsel %vm1072_vm2, %v4708_v57, 0.0 }
 0xb64   : > { %v2949_v60 = vsub.f32 %v2838_v41, %v2941_v58  ;;  %2961 = vadd.xlane.f32.xlu0 %v2960_v59  ;;  %v4678_v41 = vld [vmem:[%s5496_s2 + $0x1e0] sm:$0xff]   ;;  %v3384_v59 = vsel %vm1072_vm2, %v4681_v54, 0 }
 0xb65   : > { %v3325_v44 = vsel %vm1072_vm2, %v4678_v41, 0 }
 0xb66   : > { %v2954_v5 = vmul.f32 1.442695, %v2949_v60 }
 0xb68   : > { %4711 = vpow2.f32 %v2954_v5 }
 0xb6a   : > { %v4710_v61 = vpop.eup %4709 }
 0xb6b   : > { %v2947_v62 = vpop.xlane.xlu1 %2946  ;;  %v2966_v63 = vsel %vm1072_vm2, %v4710_v61, 0.0 }
 0xb6c   : > { %v2951_v0 = vsub.f32 %v2930_v45, %v2947_v62  ;;  %2967 = vadd.xlane.f32.xlu0 %v2966_v63 }
 0xb6e   : > { %v2958_v2 = vmul.f32 1.442695, %v2951_v0 }
 0xb70   : > { %4713 = vpow2.f32 %v2958_v2 }
 0xb72   : > { %v4712_v4 = vpop.eup %4711 }
 0xb73   : > { %v2963_v6 = vsel %vm1072_vm2, %v4712_v4, 0.0 }
 0xb74   : > { %2964 = vadd.xlane.f32.xlu1 %v2963_v6 }
 0xb7a   : > { %v4714_v7 = vpop.eup %4713 }
 0xb7b   : > { %v2969_v8 = vsel %vm1072_vm2, %v4714_v7, 0.0 }
 0xb7c   : > { %2970 = vadd.xlane.f32.xlu1 %v2969_v8 }
 0xbf1   : > { %v2962_v9 = vpop.xlane.xlu0 %2961 }
 0xbf2   : > { %4715 = vrcp.f32 %v2962_v9 }
 0xbf9   : > { %v2968_v12 = vpop.xlane.xlu0 %2967 }
 0xbfa   : > { %4717 = vrcp.f32 %v2968_v12 }
 0xbfc   : > { %v4716_v13 = vpop.eup %4715 }
 0xbfd   : > { %v2976_v15 = vmul.f32 %v4716_v13, %v4708_v57 }
 0xbff   : > { %v2980_v16 = vpack.c.bf16 %v2976_v15, %v2976_v15 }
 0xc01   : > { %v2965_v18 = vpop.xlane.xlu1 %2964  ;;  %4536 = vmatmul.mubr.msk.bf16.vlgmr.msra.gmra.mrb[84].mxu1 %vm1072_vm2, %v2980_v16 }
 0xc02   : > { %4719 = vrcp.f32 %v2965_v18  ;;  %4546 = vmatpush3.bf16.msra.mxu1 %v3084_v17  ;;  %4547 = vmatprep.mubr.msk.bf16.mxu1 %vm4739_vm0, %v4738_v1 }
 0xc03   : > { %4557 = vmatprep.subr.bf16.mxu1 %v4738_v1 }
 0xc04   : > { %v4718_v19 = vpop.eup %4717 }
 0xc05   : > { %v2978_v20 = vmul.f32 %v4718_v19, %v4710_v61  ;;  %v4682_v61 = vld [vmem:[%s5496_s2 + $0x1f8] sm:$0xff]  }
 0xc06   : > { %v3387_v0 = vsel %vm1072_vm2, %v4682_v61, 0 }
 0xc07   : > { %v2982_v22 = vpack.c.bf16 %v2978_v20, %v2978_v20 }
 0xc09   : > { %v2971_v25 = vpop.xlane.xlu1 %2970  ;;  %4548 = vmatmul.mubr.msk.bf16.vlgmr.msra.gmra.mrb[88].mxu1 %vm1072_vm2, %v2982_v22 }
 0xc0a   : > { %4721 = vrcp.f32 %v2971_v25  ;;  %4561 = vmatprep.mubr.msk.bf16.mxu1 %vm4739_vm0, %v4738_v1  ;;  %v4048_v25 = vld [vmem:[%s5499_s5 + $0x6] ss:$0 sm:$0xff] }
 0xc0b   : > { %4558 = vmatpush3.bf16.xpose.msra.mxu1 %v3207_v23 }
 0xc0c   : > { %v4720_v27 = vpop.eup %4719  ;;  %4559 = vmatprep.subr.bf16.mxu1 %v4738_v1 }
 0xc0d   : > { %v2977_v30 = vmul.f32 %v4720_v27, %v4712_v4 }
 0xc0f   : > { %v2981_v31 = vpack.c.bf16 %v2977_v30, %v2977_v30 }
 0xc11   : > { %4542 = vmatmul.mubr.msk.bf16.vlgmr.msra.gmra.mrb[84].mxu0 %vm1072_vm2, %v2981_v31 }
 0xc12   : > { %4552 = vmatpush3.bf16.msra.mxu0 %v3130_v32  ;;  %4553 = vmatprep.mubr.msk.bf16.mxu0 %vm4739_vm0, %v4738_v1 }
 0xc13   : > { %4560 = vmatpush3.bf16.xpose.msra.mxu1 %v3210_v26  ;;  %4565 = vmatprep.subr.bf16.mxu0 %v4738_v1 }
 0xc14   : > { %v4722_v33 = vpop.eup %4721  ;;  %4573 = vmatprep.subr.bf16.mxu1 %v4738_v1 }
 0xc15   : > { %v2979_v34 = vmul.f32 %v4722_v33, %v4714_v7 }
 0xc17   : > { %v2983_v35 = vpack.c.bf16 %v2979_v34, %v2979_v34 }
 0xc19   : > { %4554 = vmatmul.mubr.msk.bf16.vlgmr.msra.gmra.mrb[88].mxu0 %vm1072_vm2, %v2983_v35 }
 0xc1a   : > { %4569 = vmatprep.mubr.msk.bf16.mxu0 %vm4739_vm0, %v4738_v1 }
 0xc1b   : > { %4566 = vmatpush3.bf16.xpose.msra.mxu0 %v3266_v38 }
 0xc1c   : > { %4567 = vmatprep.subr.bf16.mxu0 %v4738_v1 }
 0xc23   : > { %4568 = vmatpush3.bf16.xpose.msra.mxu0 %v3269_v40  ;;  %v4685_v40 = vld [vmem:[%s5497_s3 + $0x30] sm:$0xff]  }
 0xc24   : > { %4581 = vmatprep.subr.bf16.mxu0 %v4738_v1  ;;  %v3575_v41 = vsel %vm1891_vm4, %v4685_v40, 0 }
 0xcd4   : > { %v3028_v36 = vpop.f32.mrb[84].mxu1 }
 0xcd5   : > { %v3172_v42 = vpack.c.bf16 %v3028_v36, %v3028_v36  ;;  %v4537_v43 = vpop.f32.mrb[85].mxu1 }
 0xcd6   : > { %v3031_v45 = vpop.f32.mrb[86].mxu1 }
 0xcd7   : > { %v4538_v47 = vpop.f32.mrb[87].mxu1  ;;  %4562 = vmatmul.mubr.msk.bf16.vlgmr.msra.gmra.mrb[92].mxu1 %vm1072_vm2, %v3172_v42  ;;  %v4051_v45 = vld [vmem:[%s5499_s5 + $0x8] ss:$0 sm:$0xff] }
 0xcd8   : > { %4574 = vmatpush3.bf16.xpose.msra.mxu1 %v3325_v44  ;;  %4577 = vmatprep.mubr.msk.bf16.mxu1 %vm4739_vm0, %v4738_v1 }
 0xcd9   : > { %4575 = vmatprep.subr.bf16.mxu1 %v4738_v1 }
 0xcdc   : > { %v3120_v50 = vpop.f32.mrb[88].mxu1 }
 0xcdd   : > { %v4549_v51 = vpop.f32.mrb[89].mxu1  ;;  %v3174_v56 = vpack.c.bf16 %v3120_v50, %v3120_v50 }
 0xcde   : > { %v3123_v53 = vpop.f32.mrb[90].mxu1 }
 0xcdf   : > { %v4550_v48 = vpop.f32.mrb[91].mxu1 }
 0xce0   : > { %4576 = vmatpush3.bf16.xpose.msra.mxu1 %v3328_v52  ;;  %v4058_v48 = vld [vmem:[%s5500_s6 + $0x1] ss:$0 sm:$0xff] }
 0xce1   : > { %4589 = vmatprep.subr.bf16.mxu1 %v4738_v1 }
 0xce4   : > { %v3074_v55 = vpop.f32.mrb[84].mxu0 }
 0xce5   : > { %v3173_v57 = vpack.c.bf16 %v3074_v55, %v3074_v55  ;;  %v4543_v58 = vpop.f32.mrb[85].mxu0 }
 0xce6   : > { %v3077_v60 = vpop.f32.mrb[86].mxu0 }
 0xce7   : > { %4578 = vmatmul.mubr.msk.bf16.vlgmr.msra.gmra.mrb[96].mxu1 %vm1072_vm2, %v3174_v56  ;;  %v4544_v5 = vpop.f32.mrb[87].mxu0  ;;  %4570 = vmatmul.mubr.msk.bf16.vlgmr.msra.gmra.mrb[92].mxu0 %vm1072_vm2, %v3173_v57 }
 0xce8   : > { %4582 = vmatpush3.bf16.xpose.msra.mxu0 %v3384_v59  ;;  %4585 = vmatprep.mubr.msk.bf16.mxu0 %vm4739_vm0, %v4738_v1  ;;  %v4067_v5 = vld [vmem:[%s5499_s5 + $0x7] ss:$0 sm:$0xff] }
 0xce9   : > { %4583 = vmatprep.subr.bf16.mxu0 %v4738_v1  ;;  %4593 = vmatprep.mubr.msk.bf16.mxu1 %vm4739_vm0, %v4738_v1 }
 0xcea   : > { %4590 = vmatpush3.bf16.msra.mxu1 %v4683_v39 }
 0xceb   : > { %4591 = vmatprep.subr.bf16.mxu1 %v4738_v1 }
 0xcec   : > { %v3166_v62 = vpop.f32.mrb[88].mxu0 }
 0xced   : > { %v4555_v63 = vpop.f32.mrb[89].mxu0  ;;  %v3175_v6 = vpack.c.bf16 %v3166_v62, %v3166_v62 }
 0xcee   : > { %v3169_v2 = vpop.f32.mrb[90].mxu0 }
 0xcef   : > { %v4556_v4 = vpop.f32.mrb[91].mxu0 }
 0xcf0   : > { %4584 = vmatpush3.bf16.xpose.msra.mxu0 %v3387_v0 }
 0xcf1   : > { %4597 = vmatprep.subr.bf16.mxu0 %v4738_v1 }
 0xcf7   : > { %4586 = vmatmul.mubr.msk.bf16.vlgmr.msra.gmra.mrb[96].mxu0 %vm1072_vm2, %v3175_v6 }
 0xcf8   : > { %4601 = vmatprep.mubr.msk.bf16.mxu0 %vm4739_vm0, %v4738_v1  ;;  %4598 = vmatpush3.bf16.xpose.msra.mxu0 %v3575_v41 }
 0xcf9   : > { %4599 = vmatprep.subr.bf16.mxu0 %v4738_v1  ;;  %v4686_v1 = vld [vmem:[%s5497_s3 + $0x38] sm:$0xff]  }
 0xcfa   : > { %v3578_v53 = vsel %vm1891_vm4, %v4686_v1, 0 }
 0xd00   : > { %4600 = vmatpush3.bf16.xpose.msra.mxu0 %v3578_v53 }
 0xdaa   : > { %v3246_v7 = vpop.f32.mrb[92].mxu1 }
 0xdab   : > { %v4563_v8 = vpop.f32.mrb[93].mxu1  ;;  %v3429_v13 = vsel %vm353_vm1, %v3246_v7, 0.0 }
 0xdac   : > { %v3249_v9 = vpop.f32.mrb[94].mxu1 }
 0xdad   : > { %v4564_v10 = vpop.f32.mrb[95].mxu1 }
 0xdba   : > { %v3364_v11 = vpop.f32.mrb[96].mxu1  ;;  %v3305_v12 = vpop.f32.mrb[92].mxu0 }
 0xdbb   : > { %v3430_v14 = vsel %vm353_vm1, %v3305_v12, 0.0  ;;  %v4579_v15 = vpop.f32.mrb[97].mxu1  ;;  %v4571_v16 = vpop.f32.mrb[93].mxu0  ;;  %v3432_v3 = vsel %vm353_vm1, %v3364_v11, 0.0 }
 0xdbc   : > { %v3431_v17 = vadd.f32 %v3430_v14, %v3429_v13  ;;  %v3367_v18 = vpop.f32.mrb[98].mxu1  ;;  %v3308_v19 = vpop.f32.mrb[94].mxu0  ;;  %v4073_v16 = vld [vmem:[%s5499_s5 + $0xa] ss:$0 sm:$0xff] }
 0xdbd   : > { %v4580_v20 = vpop.f32.mrb[99].mxu1  ;;  %v4572_v21 = vpop.f32.mrb[95].mxu0  ;;  %v4074_v18 = vld [vmem:[%s5499_s5 + $0xb] ss:$0 sm:$0xff] }
 0xdbe   : > { %v3433_v22 = vadd.f32 %v3432_v3, %v3431_v17 }
 0xdca   : > { %v3423_v23 = vpop.f32.mrb[96].mxu0 }
 0xdcb   : > { %v3434_v24 = vsel %vm353_vm1, %v3423_v23, 0.0  ;;  %v4587_v27 = vpop.f32.mrb[97].mxu0 }
 0xdcc   : > { %v3435_v28 = vadd.f32 %v3434_v24, %v3433_v22  ;;  %v3426_v29 = vpop.f32.mrb[98].mxu0 }
 0xdcd   : > { %v4588_v30 = vpop.f32.mrb[99].mxu0 }
 0xdce   : > { %v3444_v31 = vadd.f32 %v4048_v25, %v3435_v28 }
 0xdd0   : > { %v3445_v26 = vadd.f32 %v3444_v31, %v5156_v46  ;;  %v4684_v46 = vld [vmem:[%s5497_s3 + $0x28] sm:$0xff]  }
 0xdd1   : > { %4592 = vmatpush3.bf16.msra.mxu1 %v4684_v46  ;;  %v4077_v31 = vld [vmem:[%s5499_s5 + $0xc] ss:$0 sm:$0xff] }
 0xdd2   : > { %v3450_v32 = vsel %vm353_vm1, %v3445_v26, 0.0 }
 0xdd3   : > { %3451 = vadd.xlane.f32.xlu0 %v3450_v32  ;;  %v4078_v32 = vld [vmem:[%s5499_s5 + $0xd] ss:$0 sm:$0xff] }
 0xe60   : > { %v3452_v33 = vpop.xlane.xlu0 %3451 }
 0xe61   : > { %v3453_v34 = vmul.f32 0.03125, %v3452_v33 }
 0xe63   : > { %v3454_v35 = vsub.f32 %v3445_v26, %v3453_v34 }
 0xe65   : > { %v3455_v37 = vmul.f32 %v3454_v35, %v3454_v35 }
 0xe67   : > { %v3456_v38 = vsel %vm353_vm1, %v3455_v37, 0.0 }
 0xe68   : > { %3457 = vadd.xlane.f32.xlu1 %v3456_v38 }
 0xef5   : > { %v3458_v36 = vpop.xlane.xlu1 %3457 }
 0xef6   : > { %v3459_v42 = vmul.f32 0.03125, %v3458_v36 }
 0xef8   : > { %v3460_v43 = vadd.f32 1e-05, %v3459_v42 }
 0xefa   : > { %4723 = vrsqrt.f32 %v3460_v43 }
 0xf04   : > { %v4724_v44 = vpop.eup %4723 }
 0xf05   : > { %v3462_v47 = vmul.f32 %v4724_v44, %v3454_v35 }
 0xf07   : > { %v3469_v50 = vmul.f32 %v4051_v45, %v3462_v47 }
 0xf09   : > { %v3476_v51 = vadd.f32 %v4052_v49, %v3469_v50 }
 0xf0b   : > { %v3477_v52 = vpack.c.bf16 %v3476_v51, %v3476_v51 }
 0xf0d   : > { %4594 = vmatmul.mubr.msk.bf16.vlgmr.msra.gmra.mrb[100].mxu1 %vm353_vm1, %v3477_v52 }
 0xfe0   : > { %v3540_v54 = vpop.f32.mrb[100].mxu1 }
 0xfe1   : > { %v3541_v55 = vadd.f32 %v4058_v48, %v3540_v54  ;;  %v4595_v56 = vpop.f32.mrb[101].mxu1 }
 0xfe2   : > { %v3543_v57 = vpop.f32.mrb[102].mxu1 }
 0xfe3   : > { %v3546_v58 = vmax.f32 %v3541_v55, 0.0  ;;  %v4596_v59 = vpop.f32.mrb[103].mxu1 }
 0xfe5   : > { %v3547_v60 = vpack.c.bf16 %v3546_v58, %v3546_v58 }
 0xfe7   : > { %4602 = vmatmul.mubr.msk.bf16.vlgmr.msra.gmra.mrb[100].mxu0 %vm1891_vm4, %v3547_v60 }
0x10ba   : > { %v3614_v61 = vpop.f32.mrb[100].mxu0 }
0x10bb   : > { %v3615_v62 = vadd.f32 %v4067_v5, %v3614_v61  ;;  %v4603_v63 = vpop.f32.mrb[101].mxu0 }
0x10bc   : > { %v3617_v0 = vpop.f32.mrb[102].mxu0 }
0x10bd   : > { %v4604_v2 = vpop.f32.mrb[103].mxu0  ;;  %v3620_v4 = vadd.f32 %v3615_v62, %v3476_v51 }
0x10bf   : > { %v3625_v6 = vsel %vm353_vm1, %v3620_v4, 0.0 }
0x10c0   : > { %3626 = vadd.xlane.f32.xlu0 %v3625_v6 }
0x114d   : > { %v3627_v7 = vpop.xlane.xlu0 %3626 }
0x114e   : > { %v3628_v8 = vmul.f32 0.03125, %v3627_v7 }
0x1150   : > { %v3629_v9 = vsub.f32 %v3620_v4, %v3628_v8 }
0x1152   : > { %v3630_v10 = vmul.f32 %v3629_v9, %v3629_v9 }
0x1154   : > { %v3631_v11 = vsel %vm353_vm1, %v3630_v10, 0.0 }
0x1155   : > { %3632 = vadd.xlane.f32.xlu1 %v3631_v11 }
0x11e2   : > { %v3633_v12 = vpop.xlane.xlu1 %3632 }
0x11e3   : > { %v3634_v13 = vmul.f32 0.03125, %v3633_v12 }
0x11e5   : > { %v3635_v14 = vadd.f32 1e-05, %v3634_v13 }
0x11e7   : > { %4725 = vrsqrt.f32 %v3635_v14 }
0x11f1   : > { %v4726_v15 = vpop.eup %4725 }
0x11f2   : > { %v3637_v17 = vmul.f32 %v4726_v15, %v3629_v9 }
0x11f4   : > { %v3644_v19 = vmul.f32 %v4073_v16, %v3637_v17 }
0x11f6   : > { %v3651_v3 = vadd.f32 %v4074_v18, %v3644_v19 }
0x11f8   : > { %v3656_v20 = vsel %vm353_vm1, %v3651_v3, 0.0 }
0x11f9   : > { %3657 = vadd.xlane.f32.xlu0 %v3656_v20 }
0x1286   : > { %v3658_v21 = vpop.xlane.xlu0 %3657 }
0x1287   : > { %v3659_v22 = vmul.f32 0.03125, %v3658_v21 }
0x1289   : > { %v3660_v23 = vsub.f32 %v3651_v3, %v3659_v22 }
0x128b   : > { %v3661_v24 = vmul.f32 %v3660_v23, %v3660_v23 }
0x128d   : > { %v3662_v25 = vsel %vm353_vm1, %v3661_v24, 0.0 }
0x128e   : > { %3663 = vadd.xlane.f32.xlu1 %v3662_v25 }
0x131b   : > { %v3664_v27 = vpop.xlane.xlu1 %3663 }
0x131c   : > { %v3665_v28 = vmul.f32 0.03125, %v3664_v27 }
0x131e   : > { %v3666_v29 = vadd.f32 1e-05, %v3665_v28 }
0x1320   : > { %4727 = vrsqrt.f32 %v3666_v29 }
0x132a   : > { %v4728_v30 = vpop.eup %4727 }
0x132b   : > { %v3668_v26 = vmul.f32 %v4728_v30, %v3660_v23 }
0x132d   : > { %v3675_v33 = vmul.f32 %v4077_v31, %v3668_v26 }
0x132f   : > { %v3682_v34 = vadd.f32 %v4078_v32, %v3675_v33 }
0x1331   : > { %3683 = vst.msk [vmem:[%s290_s9] sm:$0xff] %vm353_vm1, %v3682_v34 }
0x1332 PF: > { %s17_s24 = sadd.s32 1, %s4736_s24  }
0x1333   : > { %p14_p4 = scmp.ge.s32.totalorder %s17_s24, 4  }
0x1335   :  { %16 = sbr.rel (!%p14_p4) target bundleno = 1 (0x1), region = 110 }

</bundles_post_ra>
